<compile_context>
chip_gen: v7x
topology: tpu7x:2x2x1
jax: 0.10.0
libtpu: 0.0.40
codegen_flags: <defaults>
</compile_context>

<pallas_src>
import functools

import jax
import jax.numpy as jnp
import numpy as np
from jax.experimental import pallas as pl
from jax.experimental.pallas import tpu as pltpu


def _round_up(x, m):
    return ((x + m - 1) // m) * m


def _vmem_capacity_bytes():
    """Per-generation VMEM capacity (64 MiB v7x, 128 MiB v5e/v6e)."""
    try:
        return int(pltpu.get_tpu_info().vmem_capacity_bytes)
    except Exception:
        return 64 * 1024 * 1024  # conservative default (v7x)


# --------------------------------------------------------------- kernels ----

def in_proj_kernel(x_ref, w_in_ref, b_in_ref, wo0_ref, b_out_ref,
                   h_ref, out_ref):
    """h0 = x @ W_in + b_in ;  out = b_out + h0 @ W_out_slice[0]."""
    h = jnp.dot(x_ref[...], w_in_ref[...],
                preferred_element_type=jnp.float32) + b_in_ref[...]
    h_ref[...] = h.astype(h_ref.dtype)
    out_ref[...] = (jnp.dot(h.astype(jnp.bfloat16), wo0_ref[...],
                            preferred_element_type=jnp.float32)
                    + b_out_ref[...])


def gin_fused_kernel(a_ref, h0_ref, w_ref, b_ref, wo_ref, outp_ref,
                     out_ref, h_cur, h_next, *, tm):
    """All GIN layers in one call.  grid = (layer, row_tile).

    A_hat (int8), h0, out_prev and the output block are VMEM-resident
    (constant index maps); h is carried across layers in (h_cur, h_next)
    scratch.  Per step: cast the (tm, N) int8 A tile to bf16, aggregate,
    apply W_l + b_l, write the new h rows, and accumulate h_new @ Wo_l into
    the resident output block.
    """
    l = pl.program_id(0)
    i = pl.program_id(1)
    row = pl.multiple_of(i * tm, tm)

    @pl.when(jnp.logical_and(l == 0, i == 0))
    def _():
        h_cur[...] = h0_ref[...]          # prime the layer-carry buffer with h0
        out_ref[...] = outp_ref[...]      # running output starts from in_proj's out

    # int8 -> bf16 cast on the VPU (free in the mem-bound regime).
    a_tile = a_ref[pl.ds(row, tm), :].astype(jnp.float32).astype(jnp.bfloat16)
    agg = jnp.dot(a_tile, h_cur[...], preferred_element_type=jnp.float32)
    h_new = (jnp.dot(agg.astype(jnp.bfloat16), w_ref[...],
                     preferred_element_type=jnp.float32) + b_ref[...])
    h_new_bf = h_new.astype(jnp.bfloat16)
    h_next[pl.ds(row, tm), :] = h_new_bf
    out_ref[pl.ds(row, tm), :] += jnp.dot(h_new_bf, wo_ref[...],
                                          preferred_element_type=jnp.float32)

    # End of a layer: publish h_{l+1} for the next layer's reads.
    @pl.when(i == pl.num_programs(1) - 1)
    def _():
        h_cur[...] = h_next[...]


def gin_layer_kernel(a_ref, h_ref, w_ref, b_ref, wo_ref, out_prev_ref,
                     h_out_ref, out_new_ref, acc_ref):
    """Streaming fallback: one GIN layer fused with its out-projection slice.

    grid = (row_tiles, k_tiles).  k reduces A_hat @ h into the f32 VMEM
    accumulator; at the last k:  h_new = agg @ W + b ,
    out_new = out_prev + h_new @ W_out_slice[l].
    """
    k = pl.program_id(1)

    @pl.when(k == 0)
    def _():
        acc_ref[...] = jnp.zeros_like(acc_ref)

    a_tile = a_ref[...].astype(jnp.float32).astype(jnp.bfloat16)
    acc_ref[...] += jnp.dot(a_tile, h_ref[...],
                            preferred_element_type=jnp.float32)

    @pl.when(k == pl.num_programs(1) - 1)
    def _():
        h_new = (jnp.dot(acc_ref[...].astype(jnp.bfloat16), w_ref[...],
                         preferred_element_type=jnp.float32) + b_ref[...])
        h_out_ref[...] = h_new.astype(h_out_ref.dtype)
        out_new_ref[...] = out_prev_ref[...] + jnp.dot(
            h_new.astype(jnp.bfloat16), wo_ref[...],
            preferred_element_type=jnp.float32)


# --------------------------------------------------------------- wrapper ----

def _encoder_forward_impl(x, edge_index, params, n_layers, output_dim,
                          force_per_layer=False):
    f32, bf16 = jnp.float32, jnp.bfloat16
    n, in_dim = x.shape
    hidden = params["w_in"].shape[0]

    n_pad = _round_up(n, 256)          # row tiles never demote below 256
    in_pad = _round_up(in_dim, 128)
    h_pad = _round_up(hidden, 128)
    o_pad = _round_up(output_dim, 128)

    vmem_cap = _vmem_capacity_bytes()
    vmem_limit = max(min(int(0.8 * vmem_cap), 112 * 1024 * 1024),
                     32 * 1024 * 1024)

    # A_hat = A + I as int8 counts (scatter in i32 for portability, one cast).
    src, dst = edge_index[0], edge_index[1]
    a_hat = (jnp.eye(n_pad, dtype=jnp.int32)
             .at[dst, src].add(1)
             .astype(jnp.int8))

    x_p = jnp.zeros((n_pad, in_pad), bf16).at[:n, :in_dim].set(x.astype(bf16))

    def pad_w(w_t, r, c):  # w_t is (in, out)
        return jnp.zeros((r, c), bf16).at[:w_t.shape[0], :w_t.shape[1]].set(
            w_t.astype(bf16))

    def pad_b(b, c):
        return jnp.zeros((1, c), f32).at[0, :b.shape[0]].set(b.astype(f32))

    w_in_p = pad_w(params["w_in"].T, in_pad, h_pad)
    b_in_p = pad_b(params["b_in"], h_pad)
    w_l_p = [pad_w(w.T, h_pad, h_pad) for (w, _) in params["layers"]]
    b_l_p = [pad_b(b, h_pad) for (_, b) in params["layers"]]
    # Output projection split per hidden-state slice -> no in-kernel concat.
    w_out_t = params["w_out"].T  # ((L+1)*H, O)
    wo_p = [pad_w(w_out_t[l * hidden:(l + 1) * hidden], h_pad, o_pad)
            for l in range(n_layers + 1)]
    b_out_p = pad_b(params["b_out"], o_pad)

    tm = 256
    grid_rows = n_pad // tm

    # ---- in_proj (+ first slice of out_proj), gridded over row tiles -------
    h, out = pl.pallas_call(
        in_proj_kernel,
        out_shape=(jax.ShapeDtypeStruct((n_pad, h_pad), bf16),
                   jax.ShapeDtypeStruct((n_pad, o_pad), f32)),
        grid_spec=pltpu.PrefetchScalarGridSpec(
            num_scalar_prefetch=0,
            grid=(grid_rows,),
            in_specs=[pl.BlockSpec((tm, in_pad), lambda i: (i, 0)),
                      pl.BlockSpec((in_pad, h_pad), lambda i: (0, 0)),
                      pl.BlockSpec((1, h_pad), lambda i: (0, 0)),
                      pl.BlockSpec((h_pad, o_pad), lambda i: (0, 0)),
                      pl.BlockSpec((1, o_pad), lambda i: (0, 0))],
            out_specs=(pl.BlockSpec((tm, h_pad), lambda i: (i, 0)),
                       pl.BlockSpec((tm, o_pad), lambda i: (i, 0)))),
        compiler_params=pltpu.CompilerParams(
            dimension_semantics=("parallel",), vmem_limit_bytes=vmem_limit),
    )(x_p, w_in_p, b_in_p, wo_p[0], b_out_p)

    if n_layers == 0:
        return out[:n, :output_dim]

    # VMEM working set of the fused path (pessimistic 2x buffering on blocks).
    fused_bytes = (
        2 * n_pad * n_pad * 1                                  # resident A (int8)
        + 2 * n_pad * h_pad * 2                                # resident h0 input
        + 2 * (h_pad * h_pad * 2 + h_pad * 4 + h_pad * o_pad * 2)  # layer weights
        + 2 * n_pad * o_pad * 4 * 2                            # out_prev + out blocks
        + 2 * n_pad * h_pad * 2                                # h_cur + h_next scratch
        + tm * n_pad * (1 + 4 + 2)                             # A-tile cast temps
        + 3 * tm * h_pad * 4                                   # agg / h_new temps
        + 4 * 1024 * 1024)                                     # slack
    use_fused = (not force_per_layer) and (fused_bytes <= vmem_limit)

    if use_fused:
        # ---- all GIN layers in ONE pallas_call; A_hat / h stay on-chip -----
        w_stack = jnp.stack(w_l_p)        # (L, h_pad, h_pad) bf16
        b_stack = jnp.stack(b_l_p)        # (L, 1, h_pad)     f32
        wo_stack = jnp.stack(wo_p[1:])    # (L, h_pad, o_pad) bf16

        out = pl.pallas_call(
            functools.partial(gin_fused_kernel, tm=tm),
            out_shape=jax.ShapeDtypeStruct((n_pad, o_pad), f32),
            grid_spec=pltpu.PrefetchScalarGridSpec(
                num_scalar_prefetch=0,
                grid=(n_layers, grid_rows),
                in_specs=[
                    pl.BlockSpec((n_pad, n_pad), lambda l, i: (0, 0)),   # A_hat
                    pl.BlockSpec((n_pad, h_pad), lambda l, i: (0, 0)),   # h0
                    pl.BlockSpec((None, h_pad, h_pad), lambda l, i: (l, 0, 0)),
                    pl.BlockSpec((None, 1, h_pad), lambda l, i: (l, 0, 0)),
                    pl.BlockSpec((None, h_pad, o_pad), lambda l, i: (l, 0, 0)),
                    pl.BlockSpec((n_pad, o_pad), lambda l, i: (0, 0)),   # out_prev
                ],
                out_specs=pl.BlockSpec((n_pad, o_pad), lambda l, i: (0, 0)),
                scratch_shapes=[pltpu.VMEM((n_pad, h_pad), bf16),
                                pltpu.VMEM((n_pad, h_pad), bf16)]),
            compiler_params=pltpu.CompilerParams(
                dimension_semantics=("arbitrary", "arbitrary"),
                vmem_limit_bytes=vmem_limit),
            input_output_aliases={5: 0},
        )(a_hat, h, w_stack, b_stack, wo_stack, out)
    else:
        # ---- streaming per-layer fallback (large graphs) --------------------
        if n_pad % 512 == 0 and n_pad // 512 >= 2:
            tm_f = 512
        elif n_pad // 256 >= 2:
            tm_f = 256
        else:
            tm_f = 128                    # guarantees >=2 row tiles (v7x megacore)
        tk = 512 if n_pad % 512 == 0 else 256
        grid_rows_f = n_pad // tm_f
        grid_k = n_pad // tk

        layer_call = pl.pallas_call(
            gin_layer_kernel,
            out_shape=(jax.ShapeDtypeStruct((n_pad, h_pad), bf16),
                       jax.ShapeDtypeStruct((n_pad, o_pad), f32)),
            grid_spec=pltpu.PrefetchScalarGridSpec(
                num_scalar_prefetch=0,
                grid=(grid_rows_f, grid_k),
                in_specs=[pl.BlockSpec((tm_f, tk), lambda i, k: (i, k)),
                          pl.BlockSpec((tk, h_pad), lambda i, k: (k, 0)),
                          pl.BlockSpec((h_pad, h_pad), lambda i, k: (0, 0)),
                          pl.BlockSpec((1, h_pad), lambda i, k: (0, 0)),
                          pl.BlockSpec((h_pad, o_pad), lambda i, k: (0, 0)),
                          pl.BlockSpec((tm_f, o_pad), lambda i, k: (i, 0))],
                out_specs=(pl.BlockSpec((tm_f, h_pad), lambda i, k: (i, 0)),
                           pl.BlockSpec((tm_f, o_pad), lambda i, k: (i, 0))),
                scratch_shapes=[pltpu.VMEM((tm_f, h_pad), jnp.float32)]),
            compiler_params=pltpu.CompilerParams(
                dimension_semantics=("parallel", "arbitrary"),
                vmem_limit_bytes=vmem_limit),
            input_output_aliases={5: 1},      # running out updated in place
        )

        for l in range(n_layers):
            h, out = layer_call(a_hat, h, w_l_p[l], b_l_p[l], wo_p[l + 1], out)

    return out[:n, :output_dim]


encoder_forward = jax.jit(
    _encoder_forward_impl,
    static_argnames=("n_layers", "output_dim", "force_per_layer"))


# ---------------------------------------------------------- init / reference

def init_params(key, input_dim, hidden_dim, output_dim, n_layers):
    """Deterministic params (PyTorch Linear convention: W is (out, in))."""
    keys = jax.random.split(key, 2 * (n_layers + 2))
    k = iter(keys)

    def lin(kin, kout, d_in, d_out):
        w = jax.random.normal(kin, (d_out, d_in), jnp.float32) * (1.0 / np.sqrt(d_in))
        b = jax.random.normal(kout, (d_out,), jnp.float32) * 0.01
        return w, b

    w_in, b_in = lin(next(k), next(k), input_dim, hidden_dim)
    layers = [lin(next(k), next(k), hidden_dim, hidden_dim) for _ in range(n_layers)]
    w_out, b_out = lin(next(k), next(k), (n_layers + 1) * hidden_dim, output_dim)
    return {"w_in": w_in, "b_in": b_in, "layers": layers,
            "w_out": w_out, "b_out": b_out}


def encoder_forward_ref(x, edge_index, params):
    """Pure-JAX reference for the PyTorch forward (gnn='gin', eps=0), mirroring
    the kernel's dtype flow (bf16 MXU inputs, f32 accumulation)."""
    bf = lambda a: a.astype(jnp.bfloat16)
    dot = lambda a, b: jnp.dot(bf(a), bf(b), preferred_element_type=jnp.float32)
    n = x.shape[0]
    src, dst = edge_index[0], edge_index[1]
    a_hat = (jnp.zeros((n, n), jnp.float32).at[dst, src].add(1.0)
             + jnp.eye(n, dtype=jnp.float32))
    h = dot(x, params["w_in"].T) + params["b_in"]
    hs = [h]
    for (w, b) in params["layers"]:
        h = dot(dot(a_hat, h), w.T) + b
        hs.append(h)
    cat = jnp.concatenate(hs, axis=1)
    return dot(cat, params["w_out"].T) + params["b_out"]


if __name__ == "__main__":
    N_NODES = 16
    INPUT_DIM = 8
    HIDDEN_DIM = 32
    OUTPUT_DIM = 16
    N_LAYERS = 2

    key = jax.random.PRNGKey(0)
    k_x, k_p = jax.random.split(key)

    x = jax.random.normal(k_x, (N_NODES, INPUT_DIM), jnp.float32)

    # Deterministic graph: bidirectional ring over the nodes.
    src = np.arange(N_NODES, dtype=np.int32)
    dst = (src + 1) % N_NODES
    edge_index = jnp.asarray(
        np.stack([np.concatenate([src, dst]), np.concatenate([dst, src])], axis=0),
        dtype=jnp.int32)  # (2, 2*N_NODES)

    params = init_params(k_p, INPUT_DIM, HIDDEN_DIM, OUTPUT_DIM, N_LAYERS)

    # Main path: fully fused (A_hat / h resident in VMEM).
    out = encoder_forward(x, edge_index, params,
                          n_layers=N_LAYERS, output_dim=OUTPUT_DIM)
    out = jax.block_until_ready(out)
    ref = encoder_forward_ref(x, edge_index, params)
    np.testing.assert_allclose(np.asarray(out), np.asarray(ref),
                               rtol=2e-3, atol=2e-3)

    # Also validate the streaming per-layer fallback (multi-row-tile path) on a
    # slightly larger ring graph.
    N2 = 300
    x2 = jax.random.normal(jax.random.PRNGKey(1), (N2, INPUT_DIM), jnp.float32)
    src2 = np.arange(N2, dtype=np.int32)
    dst2 = (src2 + 1) % N2
    edge_index2 = jnp.asarray(
        np.stack([np.concatenate([src2, dst2]), np.concatenate([dst2, src2])], 0),
        dtype=jnp.int32)
    out2 = encoder_forward(x2, edge_index2, params,
                           n_layers=N_LAYERS, output_dim=OUTPUT_DIM,
                           force_per_layer=True)
    out2 = jax.block_until_ready(out2)
    ref2 = encoder_forward_ref(x2, edge_index2, params)
    np.testing.assert_allclose(np.asarray(out2), np.asarray(ref2),
                               rtol=2e-3, atol=2e-3)

    print("KERNEL_OK")
</pallas_src>

<mosaic_0001>
module attributes {stable_mosaic.version = 11 : i64} {
  func.func private @main(%arg0: i32) attributes {dimension_semantics = [#tpu.dimension_semantics<core_parallel>], iteration_bounds = array<i64: 2>, tpu.core_type = #tpu.core_type<sc_scalar_subcore>, window_params = []} {
    return
  }
}

module attributes {stable_mosaic.version = 11 : i64} {
  func.func private @main(%arg0: i32) attributes {dimension_semantics = [#tpu.dimension_semantics<core_parallel>], iteration_bounds = array<i64: 2>, tpu.core_type = #tpu.core_type<sc_scalar_subcore>, window_params = []} {
    return
  }
}

module attributes {stable_mosaic.version = 11 : i64} {
  func.func @in_proj_kernel(%arg0: i32, %arg1: memref<256x128xbf16, #tpu.memory_space<vmem>>, %arg2: memref<128x128xbf16, #tpu.memory_space<vmem>>, %arg3: memref<1x128xf32, #tpu.memory_space<vmem>>, %arg4: memref<128x128xbf16, #tpu.memory_space<vmem>>, %arg5: memref<1x128xf32, #tpu.memory_space<vmem>>, %arg6: memref<256x128xbf16, #tpu.memory_space<vmem>>, %arg7: memref<256x128xf32, #tpu.memory_space<vmem>>) attributes {dimension_semantics = [#tpu.dimension_semantics<parallel>], iteration_bounds = array<i64: 1>, scalar_prefetch = 0 : i64, scratch_operands = 0 : i64, tpu.core_type = #tpu.core_type<tc>, window_params = [{transform_indices = @transform_0, window_bounds = array<i64: 256, 128>}, {pipeline_mode = #tpu.pipeline_mode<synchronous>, transform_indices = @transform_1, window_bounds = array<i64: 128, 128>}, {pipeline_mode = #tpu.pipeline_mode<synchronous>, transform_indices = @transform_2, window_bounds = array<i64: 1, 128>}, {pipeline_mode = #tpu.pipeline_mode<synchronous>, transform_indices = @transform_3, window_bounds = array<i64: 128, 128>}, {pipeline_mode = #tpu.pipeline_mode<synchronous>, transform_indices = @transform_4, window_bounds = array<i64: 1, 128>}, {transform_indices = @transform_5, window_bounds = array<i64: 256, 128>}, {transform_indices = @transform_6, window_bounds = array<i64: 256, 128>}]} {
    %c0 = arith.constant 0 : index
    %c0_0 = arith.constant 0 : index
    %0 = vector.load %arg1[%c0, %c0_0] : memref<256x128xbf16, #tpu.memory_space<vmem>>, vector<256x128xbf16>
    %c0_1 = arith.constant 0 : index
    %c0_2 = arith.constant 0 : index
    %1 = vector.load %arg2[%c0_1, %c0_2] : memref<128x128xbf16, #tpu.memory_space<vmem>>, vector<128x128xbf16>
    %cst = arith.constant dense<0.000000e+00> : vector<256x128xf32>
    %2 = tpu.matmul %0, %1, %cst {dimension_numbers = #tpu.dot_dimension_numbers<[1], [0], [0], [1], [0, 0, 1, 1], [], []>} : vector<256x128xbf16>, vector<128x128xbf16>, vector<256x128xf32> -> vector<256x128xf32>
    %c0_3 = arith.constant 0 : index
    %c0_4 = arith.constant 0 : index
    %3 = vector.load %arg3[%c0_3, %c0_4] : memref<1x128xf32, #tpu.memory_space<vmem>>, vector<1x128xf32>
    %4 = vector.broadcast %3 : vector<1x128xf32> to vector<256x128xf32>
    %5 = arith.addf %2, %4 : vector<256x128xf32>
    %6 = arith.truncf %5 : vector<256x128xf32> to vector<256x128xbf16>
    %c0_5 = arith.constant 0 : index
    %c0_6 = arith.constant 0 : index
    %7 = vector.load %arg6[%c0_5, %c0_6] : memref<256x128xbf16, #tpu.memory_space<vmem>>, vector<256x128xbf16>
    tpu.vector_store %arg6[%c0_5, %c0_6], %6 {strides = array<i32>} : memref<256x128xbf16, #tpu.memory_space<vmem>>, vector<256x128xbf16>,
    %8 = arith.truncf %5 : vector<256x128xf32> to vector<256x128xbf16>
    %c0_7 = arith.constant 0 : index
    %c0_8 = arith.constant 0 : index
    %9 = vector.load %arg4[%c0_7, %c0_8] : memref<128x128xbf16, #tpu.memory_space<vmem>>, vector<128x128xbf16>
    %cst_9 = arith.constant dense<0.000000e+00> : vector<256x128xf32>
    %10 = tpu.matmul %8, %9, %cst_9 {dimension_numbers = #tpu.dot_dimension_numbers<[1], [0], [0], [1], [0, 0, 1, 1], [], []>} : vector<256x128xbf16>, vector<128x128xbf16>, vector<256x128xf32> -> vector<256x128xf32>
    %c0_10 = arith.constant 0 : index
    %c0_11 = arith.constant 0 : index
    %11 = vector.load %arg5[%c0_10, %c0_11] : memref<1x128xf32, #tpu.memory_space<vmem>>, vector<1x128xf32>
    %12 = vector.broadcast %11 : vector<1x128xf32> to vector<256x128xf32>
    %13 = arith.addf %10, %12 : vector<256x128xf32>
    %c0_12 = arith.constant 0 : index
    %c0_13 = arith.constant 0 : index
    %14 = vector.load %arg7[%c0_12, %c0_13] : memref<256x128xf32, #tpu.memory_space<vmem>>, vector<256x128xf32>
    tpu.vector_store %arg7[%c0_12, %c0_13], %13 {strides = array<i32>} : memref<256x128xf32, #tpu.memory_space<vmem>>, vector<256x128xf32>,
    return
  }
  func.func @transform_0(%arg0: i32) -> (i32, i32) {
    %c0_i32 = arith.constant 0 : i32
    %c0_i32_0 = arith.constant 0 : i32
    return %arg0, %c0_i32 : i32, i32
  }
  func.func @transform_1(%arg0: i32) -> (i32, i32) {
    %c0_i32 = arith.constant 0 : i32
    %c0_i32_0 = arith.constant 0 : i32
    %c0_i32_1 = arith.constant 0 : i32
    return %c0_i32, %c0_i32_0 : i32, i32
  }
  func.func @transform_2(%arg0: i32) -> (i32, i32) {
    %c0_i32 = arith.constant 0 : i32
    %c0_i32_0 = arith.constant 0 : i32
    %c0_i32_1 = arith.constant 0 : i32
    return %c0_i32, %c0_i32_0 : i32, i32
  }
  func.func @transform_3(%arg0: i32) -> (i32, i32) {
    %c0_i32 = arith.constant 0 : i32
    %c0_i32_0 = arith.constant 0 : i32
    %c0_i32_1 = arith.constant 0 : i32
    return %c0_i32, %c0_i32_0 : i32, i32
  }
  func.func @transform_4(%arg0: i32) -> (i32, i32) {
    %c0_i32 = arith.constant 0 : i32
    %c0_i32_0 = arith.constant 0 : i32
    %c0_i32_1 = arith.constant 0 : i32
    return %c0_i32, %c0_i32_0 : i32, i32
  }
  func.func @transform_5(%arg0: i32) -> (i32, i32) {
    %c0_i32 = arith.constant 0 : i32
    %c0_i32_0 = arith.constant 0 : i32
    return %arg0, %c0_i32 : i32, i32
  }
  func.func @transform_6(%arg0: i32) -> (i32, i32) {
    %c0_i32 = arith.constant 0 : i32
    %c0_i32_0 = arith.constant 0 : i32
    return %arg0, %c0_i32 : i32, i32
  }
}

module attributes {stable_mosaic.version = 11 : i64} {
  func.func @gin_fused_kernel(%arg0: i32, %arg1: i32, %arg2: memref<256x256xi8, #tpu.memory_space<vmem>>, %arg3: memref<256x128xbf16, #tpu.memory_space<vmem>>, %arg4: memref<1x128x128xbf16, #tpu.memory_space<vmem>>, %arg5: memref<1x1x128xf32, #tpu.memory_space<vmem>>, %arg6: memref<1x128x128xbf16, #tpu.memory_space<vmem>>, %arg7: memref<256x128xf32, #tpu.memory_space<vmem>>, %arg8: memref<256x128xf32, #tpu.memory_space<vmem>>, %arg9: memref<256x128xbf16, #tpu.memory_space<vmem>>, %arg10: memref<256x128xbf16, #tpu.memory_space<vmem>>) attributes {dimension_semantics = [#tpu.dimension_semantics<arbitrary>, #tpu.dimension_semantics<arbitrary>], iteration_bounds = array<i64: 2, 1>, scalar_prefetch = 0 : i64, scratch_operands = 2 : i64, tpu.core_type = #tpu.core_type<tc>, window_params = [{pipeline_mode = #tpu.pipeline_mode<synchronous>, transform_indices = @transform_0, window_bounds = array<i64: 256, 256>}, {pipeline_mode = #tpu.pipeline_mode<synchronous>, transform_indices = @transform_1, window_bounds = array<i64: 256, 128>}, {transform_indices = @transform_2, window_bounds = array<i64: 1, 128, 128>}, {transform_indices = @transform_3, window_bounds = array<i64: 1, 1, 128>}, {transform_indices = @transform_4, window_bounds = array<i64: 1, 128, 128>}, {pipeline_mode = #tpu.pipeline_mode<synchronous>, transform_indices = @transform_5, window_bounds = array<i64: 256, 128>}, {pipeline_mode = #tpu.pipeline_mode<synchronous>, transform_indices = @transform_6, window_bounds = array<i64: 256, 128>}]} {
    %c256_i32 = arith.constant 256 : i32
    %0 = arith.muli %arg1, %c256_i32 : i32
    %1 = tpu.assume_multiple %0, 256 : i32
    %c0_i32 = arith.constant 0 : i32
    %2 = arith.cmpi eq, %arg0, %c0_i32 : i32
    %c0_i32_0 = arith.constant 0 : i32
    %3 = arith.cmpi eq, %arg1, %c0_i32_0 : i32
    %4 = arith.andi %2, %3 : i1
    %5 = arith.extui %4 : i1 to i32
    %c0_i32_1 = arith.constant 0 : i32
    %6 = arith.cmpi ne, %5, %c0_i32_1 : i32
    scf.if %6 {
      %c0_20 = arith.constant 0 : index
      %c0_21 = arith.constant 0 : index
      %35 = vector.load %arg3[%c0_20, %c0_21] : memref<256x128xbf16, #tpu.memory_space<vmem>>, vector<256x128xbf16>
      %c0_22 = arith.constant 0 : index
      %c0_23 = arith.constant 0 : index
      %36 = vector.load %arg9[%c0_22, %c0_23] : memref<256x128xbf16, #tpu.memory_space<vmem>>, vector<256x128xbf16>
      tpu.vector_store %arg9[%c0_22, %c0_23], %35 {strides = array<i32>} : memref<256x128xbf16, #tpu.memory_space<vmem>>, vector<256x128xbf16>,
      %c0_24 = arith.constant 0 : index
      %c0_25 = arith.constant 0 : index
      %37 = vector.load %arg7[%c0_24, %c0_25] : memref<256x128xf32, #tpu.memory_space<vmem>>, vector<256x128xf32>
      %c0_26 = arith.constant 0 : index
      %c0_27 = arith.constant 0 : index
      %38 = vector.load %arg8[%c0_26, %c0_27] : memref<256x128xf32, #tpu.memory_space<vmem>>, vector<256x128xf32>
      tpu.vector_store %arg8[%c0_26, %c0_27], %37 {strides = array<i32>} : memref<256x128xf32, #tpu.memory_space<vmem>>, vector<256x128xf32>,
    } else {
    }
    %7 = arith.index_cast %1 : i32 to index
    %c0 = arith.constant 0 : index
    %8 = vector.load %arg2[%7, %c0] : memref<256x256xi8, #tpu.memory_space<vmem>>, vector<256x256xi8>
    %9 = arith.sitofp %8 : vector<256x256xi8> to vector<256x256xf32>
    %10 = arith.truncf %9 : vector<256x256xf32> to vector<256x256xbf16>
    %c0_2 = arith.constant 0 : index
    %c0_3 = arith.constant 0 : index
    %11 = vector.load %arg9[%c0_2, %c0_3] : memref<256x128xbf16, #tpu.memory_space<vmem>>, vector<256x128xbf16>
    %cst = arith.constant dense<0.000000e+00> : vector<256x128xf32>
    %12 = tpu.matmul %10, %11, %cst {dimension_numbers = #tpu.dot_dimension_numbers<[1], [0], [0], [1], [0, 0, 1, 1], [], []>} : vector<256x256xbf16>, vector<256x128xbf16>, vector<256x128xf32> -> vector<256x128xf32>
    %13 = arith.truncf %12 : vector<256x128xf32> to vector<256x128xbf16>
    %c0_4 = arith.constant 0 : index
    %c0_5 = arith.constant 0 : index
    %c0_6 = arith.constant 0 : index
    %14 = vector.load %arg4[%c0_4, %c0_5, %c0_6] : memref<1x128x128xbf16, #tpu.memory_space<vmem>>, vector<1x128x128xbf16>
    %15 = vector.shape_cast %14 : vector<1x128x128xbf16> to vector<128x128xbf16>
    %cst_7 = arith.constant dense<0.000000e+00> : vector<256x128xf32>
    %16 = tpu.matmul %13, %15, %cst_7 {dimension_numbers = #tpu.dot_dimension_numbers<[1], [0], [0], [1], [0, 0, 1, 1], [], []>} : vector<256x128xbf16>, vector<128x128xbf16>, vector<256x128xf32> -> vector<256x128xf32>
    %c0_8 = arith.constant 0 : index
    %c0_9 = arith.constant 0 : index
    %c0_10 = arith.constant 0 : index
    %17 = vector.load %arg5[%c0_8, %c0_9, %c0_10] : memref<1x1x128xf32, #tpu.memory_space<vmem>>, vector<1x1x128xf32>
    %18 = vector.shape_cast %17 : vector<1x1x128xf32> to vector<1x128xf32>
    %19 = vector.broadcast %18 : vector<1x128xf32> to vector<256x128xf32>
    %20 = arith.addf %16, %19 : vector<256x128xf32>
    %21 = arith.truncf %20 : vector<256x128xf32> to vector<256x128xbf16>
    %22 = arith.index_cast %1 : i32 to index
    %c0_11 = arith.constant 0 : index
    %23 = vector.load %arg10[%22, %c0_11] : memref<256x128xbf16, #tpu.memory_space<vmem>>, vector<256x128xbf16>
    tpu.vector_store %arg10[%22, %c0_11], %21 {strides = array<i32>} : memref<256x128xbf16, #tpu.memory_space<vmem>>, vector<256x128xbf16>,
    %24 = arith.index_cast %1 : i32 to index
    %c0_12 = arith.constant 0 : index
    %25 = vector.load %arg8[%24, %c0_12] : memref<256x128xf32, #tpu.memory_space<vmem>>, vector<256x128xf32>
    %c0_13 = arith.constant 0 : index
    %c0_14 = arith.constant 0 : index
    %c0_15 = arith.constant 0 : index
    %26 = vector.load %arg6[%c0_13, %c0_14, %c0_15] : memref<1x128x128xbf16, #tpu.memory_space<vmem>>, vector<1x128x128xbf16>
    %27 = vector.shape_cast %26 : vector<1x128x128xbf16> to vector<128x128xbf16>
    %cst_16 = arith.constant dense<0.000000e+00> : vector<256x128xf32>
    %28 = tpu.matmul %21, %27, %cst_16 {dimension_numbers = #tpu.dot_dimension_numbers<[1], [0], [0], [1], [0, 0, 1, 1], [], []>} : vector<256x128xbf16>, vector<128x128xbf16>, vector<256x128xf32> -> vector<256x128xf32>
    %29 = arith.addf %25, %28 : vector<256x128xf32>
    %30 = arith.index_cast %1 : i32 to index
    %c0_17 = arith.constant 0 : index
    %31 = vector.load %arg8[%30, %c0_17] : memref<256x128xf32, #tpu.memory_space<vmem>>, vector<256x128xf32>
    tpu.vector_store %arg8[%30, %c0_17], %29 {strides = array<i32>} : memref<256x128xf32, #tpu.memory_space<vmem>>, vector<256x128xf32>,
    %c0_i32_18 = arith.constant 0 : i32
    %32 = arith.cmpi eq, %arg1, %c0_i32_18 : i32
    %33 = arith.extui %32 : i1 to i32
    %c0_i32_19 = arith.constant 0 : i32
    %34 = arith.cmpi ne, %33, %c0_i32_19 : i32
    scf.if %34 {
      %c0_20 = arith.constant 0 : index
      %c0_21 = arith.constant 0 : index
      %35 = vector.load %arg10[%c0_20, %c0_21] : memref<256x128xbf16, #tpu.memory_space<vmem>>, vector<256x128xbf16>
      %c0_22 = arith.constant 0 : index
      %c0_23 = arith.constant 0 : index
      %36 = vector.load %arg9[%c0_22, %c0_23] : memref<256x128xbf16, #tpu.memory_space<vmem>>, vector<256x128xbf16>
      tpu.vector_store %arg9[%c0_22, %c0_23], %35 {strides = array<i32>} : memref<256x128xbf16, #tpu.memory_space<vmem>>, vector<256x128xbf16>,
    } else {
    }
    return
  }
  func.func @transform_0(%arg0: i32, %arg1: i32) -> (i32, i32) {
    %c0_i32 = arith.constant 0 : i32
    %c0_i32_0 = arith.constant 0 : i32
    %c0_i32_1 = arith.constant 0 : i32
    return %c0_i32, %c0_i32_0 : i32, i32
  }
  func.func @transform_1(%arg0: i32, %arg1: i32) -> (i32, i32) {
    %c0_i32 = arith.constant 0 : i32
    %c0_i32_0 = arith.constant 0 : i32
    %c0_i32_1 = arith.constant 0 : i32
    return %c0_i32, %c0_i32_0 : i32, i32
  }
  func.func @transform_2(%arg0: i32, %arg1: i32) -> (i32, i32, i32) {
    %c0_i32 = arith.constant 0 : i32
    %c0_i32_0 = arith.constant 0 : i32
    %c0_i32_1 = arith.constant 0 : i32
    return %arg0, %c0_i32, %c0_i32_0 : i32, i32, i32
  }
  func.func @transform_3(%arg0: i32, %arg1: i32) -> (i32, i32, i32) {
    %c0_i32 = arith.constant 0 : i32
    %c0_i32_0 = arith.constant 0 : i32
    %c0_i32_1 = arith.constant 0 : i32
    return %arg0, %c0_i32, %c0_i32_0 : i32, i32, i32
  }
  func.func @transform_4(%arg0: i32, %arg1: i32) -> (i32, i32, i32) {
    %c0_i32 = arith.constant 0 : i32
    %c0_i32_0 = arith.constant 0 : i32
    %c0_i32_1 = arith.constant 0 : i32
    return %arg0, %c0_i32, %c0_i32_0 : i32, i32, i32
  }
  func.func @transform_5(%arg0: i32, %arg1: i32) -> (i32, i32) {
    %c0_i32 = arith.constant 0 : i32
    %c0_i32_0 = arith.constant 0 : i32
    %c0_i32_1 = arith.constant 0 : i32
    return %c0_i32, %c0_i32_0 : i32, i32
  }
  func.func @transform_6(%arg0: i32, %arg1: i32) -> (i32, i32) {
    %c0_i32 = arith.constant 0 : i32
    %c0_i32_0 = arith.constant 0 : i32
    %c0_i32_1 = arith.constant 0 : i32
    return %c0_i32, %c0_i32_0 : i32, i32
  }
}

</mosaic_0001>

<bundles_post_ra>
// kernel: _encoder_forward_impl.2
= control target key start
LH: loop header
LB: loop body
LE: loop exit
PB: predicated region body
PF: predicated region fallthrough
CT: control target
= control target key end

     0   :  { %s1533_s1 = inlined_call_operand.vmem [shape: bf16[128,128], index: 1, kind: input, shape index: {}]   ;;  %s1534_s0 = inlined_call_operand.vmem [shape: bf16[256,128], index: 0, kind: input, shape index: {}]   ;;  %s1535_s3 = inlined_call_operand.vmem [shape: bf16[128,128], index: 3, kind: input, shape index: {}]   ;;  %s1536_s2 = inlined_call_operand.vmem [shape: f32[1,128], index: 2, kind: input, shape index: {}]   ;;  %s1537_s5 = inlined_call_operand.vmem [shape: bf16[256,128], index: 5, kind: output, shape index: {0}]   ;;  %s1538_s4 = inlined_call_operand.vmem [shape: f32[1,128], index: 4, kind: input, shape index: {}]   ;;  %s1539_s6 = inlined_call_operand.vmem [shape: f32[256,128], index: 6, kind: output, shape index: {1}]  }
   0x1   :  { %v1152_v0 = vld [vmem:[%s1533_s1] sm:$0xff]   ;;  %v1153_v1 = vld [vmem:[%s1533_s1 + $0x8] sm:$0xff]   ;;  %v1154_v2 = vld [vmem:[%s1533_s1 + $0x10] sm:$0xff]  }
   0x2   :  { %1056 = vmatprep.subr.bf16.mxu0 %v1152_v0  ;;  %v1155_v3 = vld [vmem:[%s1533_s1 + $0x18] sm:$0xff]   ;;  %v1160_v4 = vld [vmem:[%s1534_s0] sm:$0xff]   ;;  %v1157_v6 = vld [vmem:[%s1533_s1 + $0x28] sm:$0xff]  }
   0x3   :  { %1057 = vmatpush3.bf16.msra.mxu0 %v1152_v0  ;;  %1072 = vmatprep.mubr.bf16.mxu0 %v1160_v4  ;;  %v1156_v5 = vld [vmem:[%s1533_s1 + $0x20] sm:$0xff]   ;;  %v1158_v7 = vld [vmem:[%s1533_s1 + $0x30] sm:$0xff]   ;;  %v1159_v8 = vld [vmem:[%s1533_s1 + $0x38] sm:$0xff]  }
   0x4   :  { %1058 = vmatprep.subr.bf16.mxu0 %v1153_v1  ;;  %v1176_v9 = vld [vmem:[%s1535_s3] sm:$0xff]   ;;  %v1177_v10 = vld [vmem:[%s1535_s3 + $0x8] sm:$0xff]   ;;  %v1178_v11 = vld [vmem:[%s1535_s3 + $0x10] sm:$0xff]  }
   0x5   :  { %1104 = vmatprep.subr.bf16.mxu1 %v1176_v9  ;;  %v1161_v12 = vld [vmem:[%s1534_s0 + $0x8] sm:$0xff]   ;;  %v1162_v13 = vld [vmem:[%s1534_s0 + $0x10] sm:$0xff]   ;;  %v1179_v14 = vld [vmem:[%s1535_s3 + $0x18] sm:$0xff]  }
   0x6   :  { %1105 = vmatpush3.bf16.msra.mxu1 %v1176_v9  ;;  %v1180_v15 = vld [vmem:[%s1535_s3 + $0x20] sm:$0xff]   ;;  %v1163_v16 = vld [vmem:[%s1534_s0 + $0x18] sm:$0xff]   ;;  %v1181_v18 = vld [vmem:[%s1535_s3 + $0x28] sm:$0xff]  }
   0x7   :  { %1059 = vmatpush3.bf16.msra.mxu0 %v1153_v1  ;;  %1106 = vmatprep.subr.bf16.mxu1 %v1177_v10  ;;  %v1164_v17 = vld [vmem:[%s1534_s0 + $0x20] sm:$0xff]   ;;  %v1165_v19 = vld [vmem:[%s1534_s0 + $0x28] sm:$0xff]   ;;  %v1166_v20 = vld [vmem:[%s1534_s0 + $0x30] sm:$0xff]  }
   0x8   :  { %1060 = vmatprep.subr.bf16.mxu0 %v1154_v2  ;;  %v1167_v21 = vld [vmem:[%s1534_s0 + $0x38] sm:$0xff]   ;;  %v1168_v22 = vld [vmem:[%s1534_s0 + $0x40] sm:$0xff]   ;;  %v1169_v23 = vld [vmem:[%s1534_s0 + $0x48] sm:$0xff]  }
   0x9   :  { %v1170_v24 = vld [vmem:[%s1534_s0 + $0x50] sm:$0xff]   ;;  %v1171_v25 = vld [vmem:[%s1534_s0 + $0x58] sm:$0xff]   ;;  %v1172_v26 = vld [vmem:[%s1534_s0 + $0x60] sm:$0xff]  }
   0xa   :  { %1107 = vmatpush3.bf16.msra.mxu1 %v1177_v10  ;;  %v1173_v27 = vld [vmem:[%s1534_s0 + $0x68] sm:$0xff]   ;;  %v1174_v28 = vld [vmem:[%s1534_s0 + $0x70] sm:$0xff]   ;;  %v1175_v29 = vld [vmem:[%s1534_s0 + $0x78] sm:$0xff]  }
   0xb   :  { %1061 = vmatpush3.bf16.msra.mxu0 %v1154_v2  ;;  %1108 = vmatprep.subr.bf16.mxu1 %v1178_v11  ;;  %v1182_v30 = vld [vmem:[%s1535_s3 + $0x30] sm:$0xff]   ;;  %v1183_v31 = vld [vmem:[%s1535_s3 + $0x38] sm:$0xff]   ;;  %v1318_v33 = vld [vmem:[%s1536_s2] ss:$0 sm:$0xff] }
   0xc   :  { %1062 = vmatprep.subr.bf16.mxu0 %v1155_v3 }
   0xe   :  { %1109 = vmatpush3.bf16.msra.mxu1 %v1178_v11 }
   0xf   :  { %1063 = vmatpush3.bf16.msra.mxu0 %v1155_v3  ;;  %1110 = vmatprep.subr.bf16.mxu1 %v1179_v14 }
  0x10   :  { %1064 = vmatprep.subr.bf16.mxu0 %v1156_v5 }
  0x12   :  { %1111 = vmatpush3.bf16.msra.mxu1 %v1179_v14 }
  0x13   :  { %1065 = vmatpush3.bf16.msra.mxu0 %v1156_v5  ;;  %1112 = vmatprep.subr.bf16.mxu1 %v1180_v15 }
  0x14   :  { %1066 = vmatprep.subr.bf16.mxu0 %v1157_v6 }
  0x16   :  { %1113 = vmatpush3.bf16.msra.mxu1 %v1180_v15 }
  0x17   :  { %1067 = vmatpush3.bf16.msra.mxu0 %v1157_v6  ;;  %1114 = vmatprep.subr.bf16.mxu1 %v1181_v18 }
  0x18   :  { %1068 = vmatprep.subr.bf16.mxu0 %v1158_v7 }
  0x1a   :  { %1115 = vmatpush3.bf16.msra.mxu1 %v1181_v18 }
  0x1b   :  { %1069 = vmatpush3.bf16.msra.mxu0 %v1158_v7  ;;  %1116 = vmatprep.subr.bf16.mxu1 %v1182_v30 }
  0x1c   :  { %1070 = vmatprep.subr.bf16.mxu0 %v1159_v8 }
  0x1e   :  { %1117 = vmatpush3.bf16.msra.mxu1 %v1182_v30 }
  0x1f   :  { %1071 = vmatpush3.bf16.msra.mxu0 %v1159_v8  ;;  %1118 = vmatprep.subr.bf16.mxu1 %v1183_v31 }
  0x22   :  { %1073 = vmatmul.mubr.bf16.vlgmr.msra.gmra.mrb[0].mxu0 %v1161_v12  ;;  %1119 = vmatpush3.bf16.msra.mxu1 %v1183_v31 }
  0x23   :  { %1076 = vmatprep.mubr.bf16.mxu0 %v1162_v13 }
  0x2a   :  { %1077 = vmatmul.mubr.bf16.gmra.mrb[4].mxu0 %v1163_v16 }
  0x2b   :  { %1080 = vmatprep.mubr.bf16.mxu0 %v1164_v17 }
  0x32   :  { %1081 = vmatmul.mubr.bf16.gmra.mrb[8].mxu0 %v1165_v19 }
  0x33   :  { %1084 = vmatprep.mubr.bf16.mxu0 %v1166_v20 }
  0x3a   :  { %1085 = vmatmul.mubr.bf16.gmra.mrb[12].mxu0 %v1167_v21 }
  0x3b   :  { %1088 = vmatprep.mubr.bf16.mxu0 %v1168_v22 }
  0x42   :  { %1089 = vmatmul.mubr.bf16.gmra.mrb[16].mxu0 %v1169_v23 }
  0x43   :  { %1092 = vmatprep.mubr.bf16.mxu0 %v1170_v24 }
  0x4a   :  { %1093 = vmatmul.mubr.bf16.gmra.mrb[20].mxu0 %v1171_v25 }
  0x4b   :  { %1096 = vmatprep.mubr.bf16.mxu0 %v1172_v26 }
  0x52   :  { %1097 = vmatmul.mubr.bf16.gmra.mrb[24].mxu0 %v1173_v27 }
  0x53   :  { %1100 = vmatprep.mubr.bf16.mxu0 %v1174_v28 }
  0x5a   :  { %1101 = vmatmul.mubr.bf16.gmra.mrb[28].mxu0 %v1175_v29 }
  0xf5   :  { %v1074_v32 = vpop.f32.mrb[0].mxu0 }
  0xf6   :  { %v256_v34 = vpop.f32.mrb[1].mxu0  ;;  %v265_v36 = vadd.f32 %v1074_v32, %v1318_v33 }
  0xf7   :  { %v1075_v35 = vpop.f32.mrb[2].mxu0  ;;  %v257_v39 = vadd.f32 %v1318_v33, %v256_v34 }
  0xf8   :  { %v268_v37 = vadd.f32 %v1075_v35, %v1318_v33  ;;  %v259_v38 = vpop.f32.mrb[3].mxu0 }
  0xf9   :  { %v260_v40 = vadd.f32 %v1318_v33, %v259_v38 }
  0xfa   :  { %v384_v41 = vpack.c.bf16 %v268_v37, %v265_v36 }
  0xfb   :  { %v383_v42 = vpack.c.bf16 %v260_v40, %v257_v39 }
  0xfc   :  { %993 = vst [vmem:[%s1537_s5 + $0x8] sm:$0xff] %v384_v41  }
  0xfd   :  { %v1078_v43 = vpop.f32.mrb[4].mxu0  ;;  %917 = vst [vmem:[%s1537_s5] sm:$0xff] %v383_v42   ;;  %1120 = vmatprep.mubr.bf16.mxu1 %v383_v42 }
  0xfe   :  { %v272_v44 = vpop.f32.mrb[5].mxu0  ;;  %1121 = vmatmul.mubr.bf16.vlgmr.msra.gmra.mrb[0].mxu1 %v384_v41  ;;  %v281_v46 = vadd.f32 %v1078_v43, %v1318_v33 }
  0xff   :  { %v1079_v45 = vpop.f32.mrb[6].mxu0  ;;  %v273_v49 = vadd.f32 %v1318_v33, %v272_v44 }
 0x100   :  { %v284_v47 = vadd.f32 %v1079_v45, %v1318_v33  ;;  %v275_v48 = vpop.f32.mrb[7].mxu0 }
 0x101   :  { %v276_v50 = vadd.f32 %v1318_v33, %v275_v48 }
 0x102   :  { %v386_v51 = vpack.c.bf16 %v284_v47, %v281_v46 }
 0x103   :  { %v385_v52 = vpack.c.bf16 %v276_v50, %v273_v49  ;;  %v1403_v50 = vld [vmem:[%s1538_s4] ss:$0 sm:$0xff] }
 0x104   :  { %995 = vst [vmem:[%s1537_s5 + $0x18] sm:$0xff] %v386_v51  }
 0x105   :  { %994 = vst [vmem:[%s1537_s5 + $0x10] sm:$0xff] %v385_v52   ;;  %v1082_v53 = vpop.f32.mrb[8].mxu0  ;;  %1124 = vmatprep.mubr.bf16.mxu1 %v385_v52 }
 0x106   :  { %v288_v54 = vpop.f32.mrb[9].mxu0  ;;  %1125 = vmatmul.mubr.bf16.gmra.mrb[4].mxu1 %v386_v51  ;;  %v297_v56 = vadd.f32 %v1082_v53, %v1318_v33 }
 0x107   :  { %v1083_v55 = vpop.f32.mrb[10].mxu0  ;;  %v289_v59 = vadd.f32 %v1318_v33, %v288_v54 }
 0x108   :  { %v300_v57 = vadd.f32 %v1083_v55, %v1318_v33  ;;  %v291_v58 = vpop.f32.mrb[11].mxu0 }
 0x109   :  { %v292_v60 = vadd.f32 %v1318_v33, %v291_v58 }
 0x10a   :  { %v388_v61 = vpack.c.bf16 %v300_v57, %v297_v56 }
 0x10b   :  { %v387_v62 = vpack.c.bf16 %v292_v60, %v289_v59 }
 0x10c   :  { %997 = vst [vmem:[%s1537_s5 + $0x28] sm:$0xff] %v388_v61  }
 0x10d   :  { %996 = vst [vmem:[%s1537_s5 + $0x20] sm:$0xff] %v387_v62   ;;  %v1086_v63 = vpop.f32.mrb[12].mxu0  ;;  %1128 = vmatprep.mubr.bf16.mxu1 %v387_v62 }
 0x10e   :  { %v304_v0 = vpop.f32.mrb[13].mxu0  ;;  %1129 = vmatmul.mubr.bf16.gmra.mrb[8].mxu1 %v388_v61  ;;  %v313_v2 = vadd.f32 %v1086_v63, %v1318_v33 }
 0x10f   :  { %v1087_v1 = vpop.f32.mrb[14].mxu0  ;;  %v305_v5 = vadd.f32 %v1318_v33, %v304_v0 }
 0x110   :  { %v316_v3 = vadd.f32 %v1087_v1, %v1318_v33  ;;  %v307_v4 = vpop.f32.mrb[15].mxu0 }
 0x111   :  { %v308_v6 = vadd.f32 %v1318_v33, %v307_v4 }
 0x112   :  { %v390_v7 = vpack.c.bf16 %v316_v3, %v313_v2 }
 0x113   :  { %v389_v8 = vpack.c.bf16 %v308_v6, %v305_v5 }
 0x114   :  { %999 = vst [vmem:[%s1537_s5 + $0x38] sm:$0xff] %v390_v7  }
 0x115   :  { %998 = vst [vmem:[%s1537_s5 + $0x30] sm:$0xff] %v389_v8   ;;  %v1090_v9 = vpop.f32.mrb[16].mxu0  ;;  %1132 = vmatprep.mubr.bf16.mxu1 %v389_v8 }
 0x116   :  { %v320_v10 = vpop.f32.mrb[17].mxu0  ;;  %1133 = vmatmul.mubr.bf16.gmra.mrb[12].mxu1 %v390_v7  ;;  %v329_v12 = vadd.f32 %v1090_v9, %v1318_v33 }
 0x117   :  { %v1091_v11 = vpop.f32.mrb[18].mxu0  ;;  %v321_v15 = vadd.f32 %v1318_v33, %v320_v10 }
 0x118   :  { %v332_v13 = vadd.f32 %v1091_v11, %v1318_v33  ;;  %v323_v14 = vpop.f32.mrb[19].mxu0 }
 0x119   :  { %v324_v16 = vadd.f32 %v1318_v33, %v323_v14 }
 0x11a   :  { %v392_v17 = vpack.c.bf16 %v332_v13, %v329_v12 }
 0x11b   :  { %v391_v18 = vpack.c.bf16 %v324_v16, %v321_v15 }
 0x11c   :  { %1001 = vst [vmem:[%s1537_s5 + $0x48] sm:$0xff] %v392_v17  }
 0x11d   :  { %1000 = vst [vmem:[%s1537_s5 + $0x40] sm:$0xff] %v391_v18   ;;  %v1094_v19 = vpop.f32.mrb[20].mxu0  ;;  %1136 = vmatprep.mubr.bf16.mxu1 %v391_v18 }
 0x11e   :  { %v336_v20 = vpop.f32.mrb[21].mxu0  ;;  %1137 = vmatmul.mubr.bf16.gmra.mrb[16].mxu1 %v392_v17  ;;  %v345_v22 = vadd.f32 %v1094_v19, %v1318_v33 }
 0x11f   :  { %v1095_v21 = vpop.f32.mrb[22].mxu0  ;;  %v337_v25 = vadd.f32 %v1318_v33, %v336_v20 }
 0x120   :  { %v348_v23 = vadd.f32 %v1095_v21, %v1318_v33  ;;  %v339_v24 = vpop.f32.mrb[23].mxu0 }
 0x121   :  { %v340_v26 = vadd.f32 %v1318_v33, %v339_v24 }
 0x122   :  { %v394_v27 = vpack.c.bf16 %v348_v23, %v345_v22 }
 0x123   :  { %v393_v28 = vpack.c.bf16 %v340_v26, %v337_v25 }
 0x124   :  { %1003 = vst [vmem:[%s1537_s5 + $0x58] sm:$0xff] %v394_v27  }
 0x125   :  { %1002 = vst [vmem:[%s1537_s5 + $0x50] sm:$0xff] %v393_v28   ;;  %v1098_v29 = vpop.f32.mrb[24].mxu0  ;;  %1140 = vmatprep.mubr.bf16.mxu1 %v393_v28 }
 0x126   :  { %v352_v30 = vpop.f32.mrb[25].mxu0  ;;  %1141 = vmatmul.mubr.bf16.gmra.mrb[20].mxu1 %v394_v27  ;;  %v361_v32 = vadd.f32 %v1098_v29, %v1318_v33 }
 0x127   :  { %v1099_v31 = vpop.f32.mrb[26].mxu0  ;;  %v353_v36 = vadd.f32 %v1318_v33, %v352_v30 }
 0x128   :  { %v364_v34 = vadd.f32 %v1099_v31, %v1318_v33  ;;  %v355_v35 = vpop.f32.mrb[27].mxu0 }
 0x129   :  { %v356_v37 = vadd.f32 %v1318_v33, %v355_v35 }
 0x12a   :  { %v396_v38 = vpack.c.bf16 %v364_v34, %v361_v32 }
 0x12b   :  { %v395_v39 = vpack.c.bf16 %v356_v37, %v353_v36 }
 0x12c   :  { %1005 = vst [vmem:[%s1537_s5 + $0x68] sm:$0xff] %v396_v38  }
 0x12d   :  { %1004 = vst [vmem:[%s1537_s5 + $0x60] sm:$0xff] %v395_v39   ;;  %v1102_v40 = vpop.f32.mrb[28].mxu0  ;;  %1144 = vmatprep.mubr.bf16.mxu1 %v395_v39 }
 0x12e   :  { %v368_v41 = vpop.f32.mrb[29].mxu0  ;;  %1145 = vmatmul.mubr.bf16.gmra.mrb[24].mxu1 %v396_v38  ;;  %v377_v43 = vadd.f32 %v1102_v40, %v1318_v33 }
 0x12f   :  { %v1103_v42 = vpop.f32.mrb[30].mxu0  ;;  %v369_v46 = vadd.f32 %v1318_v33, %v368_v41 }
 0x130   :  { %v380_v44 = vadd.f32 %v1103_v42, %v1318_v33  ;;  %v371_v45 = vpop.f32.mrb[31].mxu0 }
 0x131   :  { %v372_v47 = vadd.f32 %v1318_v33, %v371_v45 }
 0x132   :  { %v398_v48 = vpack.c.bf16 %v380_v44, %v377_v43 }
 0x133   :  { %v397_v49 = vpack.c.bf16 %v372_v47, %v369_v46 }
 0x134   :  { %1007 = vst [vmem:[%s1537_s5 + $0x78] sm:$0xff] %v398_v48  }
 0x135   :  { %1006 = vst [vmem:[%s1537_s5 + $0x70] sm:$0xff] %v397_v49   ;;  %1148 = vmatprep.mubr.bf16.mxu1 %v397_v49 }
 0x136   :  { %1149 = vmatmul.mubr.bf16.gmra.mrb[28].mxu1 %v398_v48 }
 0x1d1   :  { %v1122_v51 = vpop.f32.mrb[0].mxu1 }
 0x1d2   :  { %v657_v33 = vadd.f32 %v1122_v51, %v1403_v50  ;;  %v648_v52 = vpop.f32.mrb[1].mxu1 }
 0x1d3   :  { %v649_v53 = vadd.f32 %v1403_v50, %v648_v52  ;;  %v1123_v54 = vpop.f32.mrb[2].mxu1 }
 0x1d4   :  { %777 = vst [vmem:[%s1539_s6 + $0x10] sm:$0xff] %v657_v33  ;;  %v660_v55 = vadd.f32 %v1123_v54, %v1403_v50  ;;  %v651_v56 = vpop.f32.mrb[3].mxu1 }
 0x1d5   :  { %775 = vst [vmem:[%s1539_s6] sm:$0xff] %v649_v53  ;;  %v652_v57 = vadd.f32 %v1403_v50, %v651_v56 }
 0x1d6   :  { %778 = vst [vmem:[%s1539_s6 + $0x18] sm:$0xff] %v660_v55 }
 0x1d7   :  { %776 = vst [vmem:[%s1539_s6 + $0x8] sm:$0xff] %v652_v57 }
 0x1d9   :  { %v1126_v58 = vpop.f32.mrb[4].mxu1 }
 0x1da   :  { %v673_v59 = vadd.f32 %v1126_v58, %v1403_v50  ;;  %v664_v60 = vpop.f32.mrb[5].mxu1 }
 0x1db   :  { %v665_v61 = vadd.f32 %v1403_v50, %v664_v60  ;;  %v1127_v62 = vpop.f32.mrb[6].mxu1 }
 0x1dc   :  { %781 = vst [vmem:[%s1539_s6 + $0x30] sm:$0xff] %v673_v59  ;;  %v676_v63 = vadd.f32 %v1127_v62, %v1403_v50  ;;  %v667_v0 = vpop.f32.mrb[7].mxu1 }
 0x1dd   :  { %779 = vst [vmem:[%s1539_s6 + $0x20] sm:$0xff] %v665_v61  ;;  %v668_v1 = vadd.f32 %v1403_v50, %v667_v0 }
 0x1de   :  { %782 = vst [vmem:[%s1539_s6 + $0x38] sm:$0xff] %v676_v63 }
 0x1df   :  { %780 = vst [vmem:[%s1539_s6 + $0x28] sm:$0xff] %v668_v1 }
 0x1e1   :  { %v1130_v2 = vpop.f32.mrb[8].mxu1 }
 0x1e2   :  { %v689_v3 = vadd.f32 %v1130_v2, %v1403_v50  ;;  %v680_v4 = vpop.f32.mrb[9].mxu1 }
 0x1e3   :  { %v681_v5 = vadd.f32 %v1403_v50, %v680_v4  ;;  %v1131_v6 = vpop.f32.mrb[10].mxu1 }
 0x1e4   :  { %785 = vst [vmem:[%s1539_s6 + $0x50] sm:$0xff] %v689_v3  ;;  %v692_v7 = vadd.f32 %v1131_v6, %v1403_v50  ;;  %v683_v8 = vpop.f32.mrb[11].mxu1 }
 0x1e5   :  { %783 = vst [vmem:[%s1539_s6 + $0x40] sm:$0xff] %v681_v5  ;;  %v684_v9 = vadd.f32 %v1403_v50, %v683_v8 }
 0x1e6   :  { %786 = vst [vmem:[%s1539_s6 + $0x58] sm:$0xff] %v692_v7 }
 0x1e7   :  { %784 = vst [vmem:[%s1539_s6 + $0x48] sm:$0xff] %v684_v9 }
 0x1e9   :  { %v1134_v10 = vpop.f32.mrb[12].mxu1 }
 0x1ea   :  { %v705_v11 = vadd.f32 %v1134_v10, %v1403_v50  ;;  %v696_v12 = vpop.f32.mrb[13].mxu1 }
 0x1eb   :  { %v697_v13 = vadd.f32 %v1403_v50, %v696_v12  ;;  %v1135_v14 = vpop.f32.mrb[14].mxu1 }
 0x1ec   :  { %789 = vst [vmem:[%s1539_s6 + $0x70] sm:$0xff] %v705_v11  ;;  %v708_v15 = vadd.f32 %v1135_v14, %v1403_v50  ;;  %v699_v16 = vpop.f32.mrb[15].mxu1 }
 0x1ed   :  { %787 = vst [vmem:[%s1539_s6 + $0x60] sm:$0xff] %v697_v13  ;;  %v700_v17 = vadd.f32 %v1403_v50, %v699_v16 }
 0x1ee   :  { %790 = vst [vmem:[%s1539_s6 + $0x78] sm:$0xff] %v708_v15 }
 0x1ef   :  { %788 = vst [vmem:[%s1539_s6 + $0x68] sm:$0xff] %v700_v17 }
 0x1f1   :  { %v1138_v18 = vpop.f32.mrb[16].mxu1 }
 0x1f2   :  { %v721_v19 = vadd.f32 %v1138_v18, %v1403_v50  ;;  %v712_v20 = vpop.f32.mrb[17].mxu1 }
 0x1f3   :  { %v713_v21 = vadd.f32 %v1403_v50, %v712_v20  ;;  %v1139_v22 = vpop.f32.mrb[18].mxu1 }
 0x1f4   :  { %793 = vst [vmem:[%s1539_s6 + $0x90] sm:$0xff] %v721_v19  ;;  %v724_v23 = vadd.f32 %v1139_v22, %v1403_v50  ;;  %v715_v24 = vpop.f32.mrb[19].mxu1 }
 0x1f5   :  { %791 = vst [vmem:[%s1539_s6 + $0x80] sm:$0xff] %v713_v21  ;;  %v716_v25 = vadd.f32 %v1403_v50, %v715_v24 }
 0x1f6   :  { %794 = vst [vmem:[%s1539_s6 + $0x98] sm:$0xff] %v724_v23 }
 0x1f7   :  { %792 = vst [vmem:[%s1539_s6 + $0x88] sm:$0xff] %v716_v25 }
 0x1f9   :  { %v1142_v26 = vpop.f32.mrb[20].mxu1 }
 0x1fa   :  { %v737_v27 = vadd.f32 %v1142_v26, %v1403_v50  ;;  %v728_v28 = vpop.f32.mrb[21].mxu1 }
 0x1fb   :  { %v729_v29 = vadd.f32 %v1403_v50, %v728_v28  ;;  %v1143_v30 = vpop.f32.mrb[22].mxu1 }
 0x1fc   :  { %797 = vst [vmem:[%s1539_s6 + $0xb0] sm:$0xff] %v737_v27  ;;  %v740_v31 = vadd.f32 %v1143_v30, %v1403_v50  ;;  %v731_v32 = vpop.f32.mrb[23].mxu1 }
 0x1fd   :  { %795 = vst [vmem:[%s1539_s6 + $0xa0] sm:$0xff] %v729_v29  ;;  %v732_v34 = vadd.f32 %v1403_v50, %v731_v32 }
 0x1fe   :  { %798 = vst [vmem:[%s1539_s6 + $0xb8] sm:$0xff] %v740_v31 }
 0x1ff   :  { %796 = vst [vmem:[%s1539_s6 + $0xa8] sm:$0xff] %v732_v34 }
 0x201   :  { %v1146_v35 = vpop.f32.mrb[24].mxu1 }
 0x202   :  { %v753_v36 = vadd.f32 %v1146_v35, %v1403_v50  ;;  %v744_v37 = vpop.f32.mrb[25].mxu1 }
 0x203   :  { %v745_v38 = vadd.f32 %v1403_v50, %v744_v37  ;;  %v1147_v39 = vpop.f32.mrb[26].mxu1 }
 0x204   :  { %801 = vst [vmem:[%s1539_s6 + $0xd0] sm:$0xff] %v753_v36  ;;  %v756_v40 = vadd.f32 %v1147_v39, %v1403_v50  ;;  %v747_v41 = vpop.f32.mrb[27].mxu1 }
 0x205   :  { %799 = vst [vmem:[%s1539_s6 + $0xc0] sm:$0xff] %v745_v38  ;;  %v748_v42 = vadd.f32 %v1403_v50, %v747_v41 }
 0x206   :  { %802 = vst [vmem:[%s1539_s6 + $0xd8] sm:$0xff] %v756_v40 }
 0x207   :  { %800 = vst [vmem:[%s1539_s6 + $0xc8] sm:$0xff] %v748_v42 }
 0x209   :  { %v1150_v43 = vpop.f32.mrb[28].mxu1 }
 0x20a   :  { %v769_v44 = vadd.f32 %v1150_v43, %v1403_v50  ;;  %v760_v45 = vpop.f32.mrb[29].mxu1 }
 0x20b   :  { %v761_v46 = vadd.f32 %v1403_v50, %v760_v45  ;;  %v1151_v47 = vpop.f32.mrb[30].mxu1 }
 0x20c   :  { %805 = vst [vmem:[%s1539_s6 + $0xf0] sm:$0xff] %v769_v44  ;;  %v772_v48 = vadd.f32 %v1151_v47, %v1403_v50  ;;  %v763_v49 = vpop.f32.mrb[31].mxu1 }
 0x20d   :  { %803 = vst [vmem:[%s1539_s6 + $0xe0] sm:$0xff] %v761_v46  ;;  %v764_v51 = vadd.f32 %v1403_v50, %v763_v49 }
 0x20e   :  { %806 = vst [vmem:[%s1539_s6 + $0xf8] sm:$0xff] %v772_v48 }
 0x20f   :  { %804 = vst [vmem:[%s1539_s6 + $0xe8] sm:$0xff] %v764_v51 }

// kernel: _encoder_forward_impl.3
= control target key start
LH: loop header
LB: loop body
LE: loop exit
PB: predicated region body
PF: predicated region fallthrough
CT: control target
= control target key end

     0   :  { %s1851_s21 = smov 0   ;;  %s1853_s22 = smov 0   ;;  %s2430_s0 = inlined_call_operand.vmem [shape: s8[256,256], index: 0, kind: input, shape index: {}]   ;;  %s2431_s1 = inlined_call_operand.vmem [shape: bf16[256,128], index: 1, kind: input, shape index: {}]   ;;  %s2432_s2 = inlined_call_operand.vmem [shape: bf16[2,128,128], index: 2, kind: input, shape index: {}]   ;;  %s2433_s3 = inlined_call_operand.vmem [shape: f32[2,1,128], index: 3, kind: input, shape index: {}]   ;;  %s2434_s4 = inlined_call_operand.vmem [shape: bf16[2,128,128], index: 4, kind: input, shape index: {}]   ;;  %s2435_s5 = inlined_call_operand.vmem [shape: f32[256,128], index: 5, kind: input, shape index: {}, may-alias: {5,6}]   ;;  %s2436_s6 = inlined_call_operand.vmem [shape: f32[256,128], index: 6, kind: output, shape index: {}, may-alias: {5,6}]  }
   0x1   :  { %s1855_s23 = smov 0  }
   0x2 LB: > { %s28_s24 = sadd.s32 1, %s1810_s22  ;;  %p1436_p0 = scmp.ge.s32.totalorder %s1814_s23, 1  ;;  %s1814_s23 = sphi %s1855_s23, %s16_s23   ;;  %s1810_s22 = sphi %s1853_s22, %s2438_s22   ;;  %s1806_s21 = sphi %s1851_s21, %s2437_s21  }
   0x3   : > { %p30_p1 = scmp.ge.s32.totalorder %s28_s24, 2  ;;  %p237_p2 = scmp.lt.s32.totalorder %s1814_s23, 3 }
   0x5   : > { %s2440_s24 = smov (%p30_p1, %s28_s24), 0  ;;  %p238_p3 = pnand %p1436_p0, %p237_p2 }
   0x6   : > { %p270_p4 = scmp.lt.s32.totalorder (!%p238_p3), %s1806_s21, 1  ;;  %p285_p5 = scmp.eq.s32.totalorder (!%p238_p3), %s1806_s21, 0 }
   0x7   : > { %241 = sbr.rel (%p238_p3) target bundleno = 931 (0x3a3), region = 44 }
   0xe   : > { %s2442_s21 = smov (!%p270_p4, %s1806_s21), 1  ;;  %290 = sbr.rel (!%p285_p5) target bundleno = 115 (0x73), region = 48 }
   0xf   : > { %s1477_s25 = sshll.u32 %s2442_s21, 6  ;;  %s277_s28 = scalar_lea.vmem %s2433_s3, %s2442_s21  ;;  %v1760_v0 = vld [vmem:[%s2431_s1] sm:$0xff] (%p285_p5)   ;;  %v1761_v1 = vld [vmem:[%s2431_s1 + $0x8] sm:$0xff] (%p285_p5)   ;;  %v1762_v2 = vld [vmem:[%s2431_s1 + $0x10] sm:$0xff] (%p285_p5)  }
  0x10   : > { %s1879_s7 = scalar_lea.vmem %s2432_s2, %s1477_s25  ;;  %s1884_s10 = scalar_lea.vmem %s2434_s4, %s1477_s25  ;;  %419 = vst [vmem:[#allocation2] sm:$0xff] (%p285_p5), %v1760_v0  ;;  %420 = vst [vmem:[#allocation2 + $0x8] sm:$0xff] (%p285_p5), %v1761_v1  ;;  %v1763_v3 = vld [vmem:[%s2431_s1 + $0x18] sm:$0xff] (%p285_p5)   ;;  %v1764_v4 = vld [vmem:[%s2431_s1 + $0x20] sm:$0xff] (%p285_p5)  }
  0x11   : > { %421 = vst [vmem:[#allocation2 + $0x10] sm:$0xff] (%p285_p5), %v1762_v2  ;;  %422 = vst [vmem:[#allocation2 + $0x18] sm:$0xff] (%p285_p5), %v1763_v3  ;;  %v1765_v5 = vld [vmem:[%s2431_s1 + $0x28] sm:$0xff] (%p285_p5)   ;;  %v1766_v6 = vld [vmem:[%s2431_s1 + $0x30] sm:$0xff] (%p285_p5)  }
  0x12   : > { %423 = vst [vmem:[#allocation2 + $0x20] sm:$0xff] (%p285_p5), %v1764_v4  ;;  %424 = vst [vmem:[#allocation2 + $0x28] sm:$0xff] (%p285_p5), %v1765_v5  ;;  %v1767_v7 = vld [vmem:[%s2431_s1 + $0x38] sm:$0xff] (%p285_p5)   ;;  %v1768_v8 = vld [vmem:[%s2431_s1 + $0x40] sm:$0xff] (%p285_p5)  }
  0x13   : > { %425 = vst [vmem:[#allocation2 + $0x30] sm:$0xff] (%p285_p5), %v1766_v6  ;;  %426 = vst [vmem:[#allocation2 + $0x38] sm:$0xff] (%p285_p5), %v1767_v7  ;;  %v1769_v9 = vld [vmem:[%s2431_s1 + $0x48] sm:$0xff] (%p285_p5)   ;;  %v1770_v10 = vld [vmem:[%s2431_s1 + $0x50] sm:$0xff] (%p285_p5)  }
  0x14   : > { %427 = vst [vmem:[#allocation2 + $0x40] sm:$0xff] (%p285_p5), %v1768_v8  ;;  %428 = vst [vmem:[#allocation2 + $0x48] sm:$0xff] (%p285_p5), %v1769_v9  ;;  %v1771_v11 = vld [vmem:[%s2431_s1 + $0x58] sm:$0xff] (%p285_p5)   ;;  %v1772_v12 = vld [vmem:[%s2431_s1 + $0x60] sm:$0xff] (%p285_p5)  }
  0x15   : > { %429 = vst [vmem:[#allocation2 + $0x50] sm:$0xff] %v1770_v10  ;;  %430 = vst [vmem:[#allocation2 + $0x58] sm:$0xff] %v1771_v11  ;;  %v1773_v13 = vld [vmem:[%s2431_s1 + $0x68] sm:$0xff]   ;;  %v1774_v14 = vld [vmem:[%s2431_s1 + $0x70] sm:$0xff]  }
  0x16   : > { %431 = vst [vmem:[#allocation2 + $0x60] sm:$0xff] %v1772_v12  ;;  %432 = vst [vmem:[#allocation2 + $0x68] sm:$0xff] %v1773_v13  ;;  %v1775_v15 = vld [vmem:[%s2431_s1 + $0x78] sm:$0xff]   ;;  %v435_v16 = vld [vmem:[%s2435_s5] sm:$0xff] }
  0x17   : > { %433 = vst [vmem:[#allocation2 + $0x70] sm:$0xff] %v1774_v14  ;;  %v436_v17 = vld [vmem:[%s2435_s5 + $0x8] sm:$0xff]  ;;  %v437_v18 = vld [vmem:[%s2435_s5 + $0x10] sm:$0xff]  ;;  %434 = vst [vmem:[#allocation2 + $0x78] sm:$0xff] %v1775_v15 }
  0x18   : > { %467 = vst [vmem:[%s2436_s6] sm:$0xff] %v435_v16  ;;  %468 = vst [vmem:[%s2436_s6 + $0x8] sm:$0xff] %v436_v17 }
  0x19   : > { %469 = vst [vmem:[%s2436_s6 + $0x10] sm:$0xff] %v437_v18 }
  0x20   : > { %v438_v19 = vld [vmem:[%s2435_s5 + $0x18] sm:$0xff]  ;;  %v439_v20 = vld [vmem:[%s2435_s5 + $0x20] sm:$0xff]  ;;  %v440_v21 = vld [vmem:[%s2435_s5 + $0x28] sm:$0xff] }
  0x21   : > { %470 = vst [vmem:[%s2436_s6 + $0x18] sm:$0xff] %v438_v19  ;;  %471 = vst [vmem:[%s2436_s6 + $0x20] sm:$0xff] %v439_v20 }
  0x22   : > { %472 = vst [vmem:[%s2436_s6 + $0x28] sm:$0xff] %v440_v21 }
  0x29   : > { %v441_v22 = vld [vmem:[%s2435_s5 + $0x30] sm:$0xff]  ;;  %v442_v23 = vld [vmem:[%s2435_s5 + $0x38] sm:$0xff]  ;;  %v443_v24 = vld [vmem:[%s2435_s5 + $0x40] sm:$0xff] }
  0x2a   : > { %473 = vst [vmem:[%s2436_s6 + $0x30] sm:$0xff] %v441_v22  ;;  %474 = vst [vmem:[%s2436_s6 + $0x38] sm:$0xff] %v442_v23 }
  0x2b   : > { %475 = vst [vmem:[%s2436_s6 + $0x40] sm:$0xff] %v443_v24 }
  0x32   : > { %v444_v25 = vld [vmem:[%s2435_s5 + $0x48] sm:$0xff]  ;;  %v445_v26 = vld [vmem:[%s2435_s5 + $0x50] sm:$0xff]  ;;  %v446_v27 = vld [vmem:[%s2435_s5 + $0x58] sm:$0xff] }
  0x33   : > { %476 = vst [vmem:[%s2436_s6 + $0x48] sm:$0xff] %v444_v25  ;;  %477 = vst [vmem:[%s2436_s6 + $0x50] sm:$0xff] %v445_v26 }
  0x34   : > { %478 = vst [vmem:[%s2436_s6 + $0x58] sm:$0xff] %v446_v27 }
  0x3b   : > { %v447_v28 = vld [vmem:[%s2435_s5 + $0x60] sm:$0xff]  ;;  %v448_v29 = vld [vmem:[%s2435_s5 + $0x68] sm:$0xff]  ;;  %v449_v30 = vld [vmem:[%s2435_s5 + $0x70] sm:$0xff] }
  0x3c   : > { %479 = vst [vmem:[%s2436_s6 + $0x60] sm:$0xff] %v447_v28  ;;  %480 = vst [vmem:[%s2436_s6 + $0x68] sm:$0xff] %v448_v29 }
  0x3d   : > { %481 = vst [vmem:[%s2436_s6 + $0x70] sm:$0xff] %v449_v30 }
  0x44   : > { %v450_v31 = vld [vmem:[%s2435_s5 + $0x78] sm:$0xff]  ;;  %v451_v32 = vld [vmem:[%s2435_s5 + $0x80] sm:$0xff]  ;;  %v452_v33 = vld [vmem:[%s2435_s5 + $0x88] sm:$0xff] }
  0x45   : > { %482 = vst [vmem:[%s2436_s6 + $0x78] sm:$0xff] %v450_v31  ;;  %483 = vst [vmem:[%s2436_s6 + $0x80] sm:$0xff] %v451_v32 }
  0x46   : > { %484 = vst [vmem:[%s2436_s6 + $0x88] sm:$0xff] %v452_v33 }
  0x4d   : > { %v453_v34 = vld [vmem:[%s2435_s5 + $0x90] sm:$0xff]  ;;  %v454_v35 = vld [vmem:[%s2435_s5 + $0x98] sm:$0xff]  ;;  %v455_v36 = vld [vmem:[%s2435_s5 + $0xa0] sm:$0xff] }
  0x4e   : > { %485 = vst [vmem:[%s2436_s6 + $0x90] sm:$0xff] %v453_v34  ;;  %486 = vst [vmem:[%s2436_s6 + $0x98] sm:$0xff] %v454_v35 }
  0x4f   : > { %487 = vst [vmem:[%s2436_s6 + $0xa0] sm:$0xff] %v455_v36 }
  0x56   : > { %v456_v37 = vld [vmem:[%s2435_s5 + $0xa8] sm:$0xff]  ;;  %v457_v38 = vld [vmem:[%s2435_s5 + $0xb0] sm:$0xff]  ;;  %v458_v39 = vld [vmem:[%s2435_s5 + $0xb8] sm:$0xff] }
  0x57   : > { %488 = vst [vmem:[%s2436_s6 + $0xa8] sm:$0xff] %v456_v37  ;;  %489 = vst [vmem:[%s2436_s6 + $0xb0] sm:$0xff] %v457_v38 }
  0x58   : > { %490 = vst [vmem:[%s2436_s6 + $0xb8] sm:$0xff] %v458_v39 }
  0x5f   : > { %v459_v40 = vld [vmem:[%s2435_s5 + $0xc0] sm:$0xff]  ;;  %v460_v41 = vld [vmem:[%s2435_s5 + $0xc8] sm:$0xff]  ;;  %v461_v42 = vld [vmem:[%s2435_s5 + $0xd0] sm:$0xff] }
  0x60   : > { %491 = vst [vmem:[%s2436_s6 + $0xc0] sm:$0xff] %v459_v40  ;;  %492 = vst [vmem:[%s2436_s6 + $0xc8] sm:$0xff] %v460_v41 }
  0x61   : > { %493 = vst [vmem:[%s2436_s6 + $0xd0] sm:$0xff] %v461_v42 }
  0x68   : > { %v462_v43 = vld [vmem:[%s2435_s5 + $0xd8] sm:$0xff]  ;;  %v463_v44 = vld [vmem:[%s2435_s5 + $0xe0] sm:$0xff]  ;;  %v464_v45 = vld [vmem:[%s2435_s5 + $0xe8] sm:$0xff] }
  0x69   : > { %494 = vst [vmem:[%s2436_s6 + $0xd8] sm:$0xff] %v462_v43  ;;  %495 = vst [vmem:[%s2436_s6 + $0xe0] sm:$0xff] %v463_v44 }
  0x6a   : > { %496 = vst [vmem:[%s2436_s6 + $0xe8] sm:$0xff] %v464_v45 }
  0x71   : > { %v465_v46 = vld [vmem:[%s2435_s5 + $0xf0] sm:$0xff]  ;;  %v466_v47 = vld [vmem:[%s2435_s5 + $0xf8] sm:$0xff] }
  0x72   : > { %497 = vst [vmem:[%s2436_s6 + $0xf0] sm:$0xff] %v465_v46  ;;  %498 = vst [vmem:[%s2436_s6 + $0xf8] sm:$0xff] %v466_v47 }
  0x73 PF: > { %v505_v53 = vld [vmem:[%s2430_s0 + $0x8] sm:$0xff]  ;;  %v564_v58 = vld [vmem:[#allocation2 + $0x60] sm:$0xff]  ;;  %v566_v62 = vld [vmem:[#allocation2 + $0x70] sm:$0xff] }
  0x74   : > { %v521_v54 = vunpack.c.l.s8.bf16 %v505_v53  ;;  %v565_v60 = vld [vmem:[#allocation2 + $0x68] sm:$0xff]  ;;  %v567_v0 = vld [vmem:[#allocation2 + $0x78] sm:$0xff]  ;;  %v1776_v1 = vld [vmem:[%s1879_s7] sm:$0xff]   ;;  %v523_v7 = vunpack.c.h.s8.bf16 %v505_v53 }
  0x75   : > { %v552_v49 = vld [vmem:[#allocation2] sm:$0xff]  ;;  %v553_v51 = vld [vmem:[#allocation2 + $0x8] sm:$0xff]  ;;  %1640 = vmatprep.subr.bf16.mxu1 %v1776_v1  ;;  %v1778_v6 = vld [vmem:[%s1879_s7 + $0x10] sm:$0xff]  }
  0x76   : > { %v554_v55 = vld [vmem:[#allocation2 + $0x10] sm:$0xff]  ;;  %600 = vmatprep.mubr.bf16.mxu0 %v521_v54  ;;  %v555_v57 = vld [vmem:[#allocation2 + $0x18] sm:$0xff]  ;;  %v1777_v2 = vld [vmem:[%s1879_s7 + $0x8] sm:$0xff]   ;;  %1641 = vmatpush3.bf16.msra.mxu1 %v1776_v1 }
  0x77   : > { %v556_v59 = vld [vmem:[#allocation2 + $0x20] sm:$0xff]  ;;  %v557_v61 = vld [vmem:[#allocation2 + $0x28] sm:$0xff]  ;;  %1642 = vmatprep.subr.bf16.mxu1 %v1777_v2  ;;  %v1779_v8 = vld [vmem:[%s1879_s7 + $0x18] sm:$0xff]  }
  0x78   : > { %v558_v63 = vld [vmem:[#allocation2 + $0x30] sm:$0xff]  ;;  %v504_v3 = vld [vmem:[%s2430_s0] sm:$0xff]  ;;  %v559_v4 = vld [vmem:[#allocation2 + $0x38] sm:$0xff] }
  0x79   : > { %v560_v48 = vld [vmem:[#allocation2 + $0x40] sm:$0xff]  ;;  %v561_v50 = vld [vmem:[#allocation2 + $0x48] sm:$0xff]  ;;  %v520_v5 = vunpack.c.l.s8.bf16 %v504_v3  ;;  %v507_v9 = vld [vmem:[%s2430_s0 + $0x18] sm:$0xff]  ;;  %v522_v10 = vunpack.c.h.s8.bf16 %v504_v3 }
  0x7a   : > { %1480 = vmatprep.subr.bf16.mxu0 %v560_v48  ;;  %v562_v52 = vld [vmem:[#allocation2 + $0x50] sm:$0xff]  ;;  %v563_v56 = vld [vmem:[#allocation2 + $0x58] sm:$0xff]  ;;  %1643 = vmatpush3.bf16.msra.mxu1 %v1777_v2  ;;  %v525_v11 = vunpack.c.l.s8.bf16 %v507_v9  ;;  %v527_v14 = vunpack.c.h.s8.bf16 %v507_v9  ;;  %v509_v15 = vld [vmem:[%s2430_s0 + $0x28] sm:$0xff] }
  0x7b   : > { %1481 = vmatpush3.bf16.msra.mxu0 %v552_v49  ;;  %1644 = vmatprep.subr.bf16.mxu1 %v1778_v6  ;;  %v506_v12 = vld [vmem:[%s2430_s0 + $0x10] sm:$0xff]  ;;  %v529_v17 = vunpack.c.l.s8.bf16 %v509_v15  ;;  %v508_v18 = vld [vmem:[%s2430_s0 + $0x20] sm:$0xff]  ;;  %v531_v20 = vunpack.c.h.s8.bf16 %v509_v15  ;;  %v511_v21 = vld [vmem:[%s2430_s0 + $0x38] sm:$0xff] }
  0x7c   : > { %1482 = vmatprep.subr.bf16.mxu0 %v561_v50  ;;  %v524_v13 = vunpack.c.l.s8.bf16 %v506_v12  ;;  %v526_v16 = vunpack.c.h.s8.bf16 %v506_v12  ;;  %v528_v19 = vunpack.c.l.s8.bf16 %v508_v18  ;;  %v530_v22 = vunpack.c.h.s8.bf16 %v508_v18  ;;  %v510_v24 = vld [vmem:[%s2430_s0 + $0x30] sm:$0xff]  ;;  %v513_v27 = vld [vmem:[%s2430_s0 + $0x48] sm:$0xff]  ;;  %v512_v30 = vld [vmem:[%s2430_s0 + $0x40] sm:$0xff] }
  0x7d   : > { %v533_v23 = vunpack.c.l.s8.bf16 %v511_v21  ;;  %v532_v25 = vunpack.c.l.s8.bf16 %v510_v24  ;;  %v535_v26 = vunpack.c.h.s8.bf16 %v511_v21  ;;  %v534_v28 = vunpack.c.h.s8.bf16 %v510_v24  ;;  %v515_v33 = vld [vmem:[%s2430_s0 + $0x58] sm:$0xff]  ;;  %v514_v36 = vld [vmem:[%s2430_s0 + $0x50] sm:$0xff]  ;;  %v1780_v39 = vld [vmem:[%s1879_s7 + $0x20] sm:$0xff]  }
  0x7e   : > { %1645 = vmatpush3.bf16.msra.mxu1 %v1778_v6  ;;  %v537_v29 = vunpack.c.l.s8.bf16 %v513_v27  ;;  %v536_v31 = vunpack.c.l.s8.bf16 %v512_v30  ;;  %v539_v32 = vunpack.c.h.s8.bf16 %v513_v27  ;;  %v538_v34 = vunpack.c.h.s8.bf16 %v512_v30  ;;  %v517_v40 = vld [vmem:[%s2430_s0 + $0x68] sm:$0xff]  ;;  %v516_v44 = vld [vmem:[%s2430_s0 + $0x60] sm:$0xff]  ;;  %v1782_v45 = vld [vmem:[%s1879_s7 + $0x30] sm:$0xff]  }
  0x7f   : > { %1483 = vmatpush3.bf16.msra.mxu0 %v553_v51  ;;  %1646 = vmatprep.subr.bf16.mxu1 %v1779_v8  ;;  %v541_v35 = vunpack.c.l.s8.bf16 %v515_v33  ;;  %v540_v37 = vunpack.c.l.s8.bf16 %v514_v36  ;;  %v543_v38 = vunpack.c.h.s8.bf16 %v515_v33  ;;  %v542_v41 = vunpack.c.h.s8.bf16 %v514_v36  ;;  %v1781_v43 = vld [vmem:[%s1879_s7 + $0x28] sm:$0xff]   ;;  %v1783_v48 = vld [vmem:[%s1879_s7 + $0x38] sm:$0xff]   ;;  %v1786_v12 = vld [vmem:[%s1884_s10 + $0x10] sm:$0xff]  }
  0x80   : > { %1484 = vmatprep.subr.bf16.mxu0 %v562_v52  ;;  %v545_v42 = vunpack.c.l.s8.bf16 %v517_v40  ;;  %v544_v46 = vunpack.c.l.s8.bf16 %v516_v44  ;;  %v547_v47 = vunpack.c.h.s8.bf16 %v517_v40  ;;  %v519_v49 = vld [vmem:[%s2430_s0 + $0x78] sm:$0xff]  ;;  %v546_v50 = vunpack.c.h.s8.bf16 %v516_v44  ;;  %v518_v52 = vld [vmem:[%s2430_s0 + $0x70] sm:$0xff]  ;;  %v1788_v21 = vld [vmem:[%s1884_s10 + $0x20] sm:$0xff]  }
  0x81   : > { %v549_v51 = vunpack.c.l.s8.bf16 %v519_v49  ;;  %v548_v53 = vunpack.c.l.s8.bf16 %v518_v52  ;;  %v551_v54 = vunpack.c.h.s8.bf16 %v519_v49 }
  0x82   : > { %1647 = vmatpush3.bf16.msra.mxu1 %v1779_v8 }
  0x83   : > { %1485 = vmatpush3.bf16.msra.mxu0 %v554_v55  ;;  %1648 = vmatprep.subr.bf16.mxu1 %v1780_v39  ;;  %v550_v55 = vunpack.c.h.s8.bf16 %v518_v52 }
  0x84   : > { %1486 = vmatprep.subr.bf16.mxu0 %v563_v56 }
  0x86   : > { %1649 = vmatpush3.bf16.msra.mxu1 %v1780_v39 }
  0x87   : > { %1487 = vmatpush3.bf16.msra.mxu0 %v555_v57  ;;  %1650 = vmatprep.subr.bf16.mxu1 %v1781_v43  ;;  %v1784_v57 = vld [vmem:[%s1884_s10] sm:$0xff]  }
  0x88   : > { %1488 = vmatprep.subr.bf16.mxu0 %v564_v58 }
  0x8a   : > { %1651 = vmatpush3.bf16.msra.mxu1 %v1781_v43 }
  0x8b   : > { %1489 = vmatpush3.bf16.msra.mxu0 %v556_v59  ;;  %1652 = vmatprep.subr.bf16.mxu1 %v1782_v45 }
  0x8c   : > { %1490 = vmatprep.subr.bf16.mxu0 %v565_v60 }
  0x8e   : > { %1653 = vmatpush3.bf16.msra.mxu1 %v1782_v45 }
  0x8f   : > { %1491 = vmatpush3.bf16.msra.mxu0 %v557_v61  ;;  %1654 = vmatprep.subr.bf16.mxu1 %v1783_v48 }
  0x90   : > { %1492 = vmatprep.subr.bf16.mxu0 %v566_v62 }
  0x92   : > { %1655 = vmatpush3.bf16.msra.mxu1 %v1783_v48 }
  0x93   : > { %1493 = vmatpush3.bf16.msra.mxu0 %v558_v63  ;;  %1688 = vmatprep.subr.bf16.mxu1 %v1784_v57 }
  0x94   : > { %1494 = vmatprep.subr.bf16.mxu0 %v567_v0 }
  0x97   : > { %1495 = vmatpush3.bf16.msra.mxu0 %v559_v4 }
  0x9a   : > { %601 = vmatmul.mubr.bf16.vlgmr.msra.gmra.mrb[0].mxu0 %v520_v5 }
  0x9b   : > { %608 = vmatprep.mubr.bf16.mxu0 %v523_v7  ;;  %v1785_v7 = vld [vmem:[%s1884_s10 + $0x8] sm:$0xff]  }
  0xa2   : > { %609 = vmatmul.mubr.bf16.gmra.mrb[4].mxu0 %v522_v10 }
  0xa3   : > { %616 = vmatprep.mubr.bf16.mxu0 %v525_v11 }
  0xaa   : > { %617 = vmatmul.mubr.bf16.gmra.mrb[8].mxu0 %v524_v13 }
  0xab   : > { %624 = vmatprep.mubr.bf16.mxu0 %v527_v14 }
  0xb2   : > { %625 = vmatmul.mubr.bf16.gmra.mrb[12].mxu0 %v526_v16  ;;  %v1787_v16 = vld [vmem:[%s1884_s10 + $0x18] sm:$0xff]  }
  0xb3   : > { %632 = vmatprep.mubr.bf16.mxu0 %v529_v17 }
  0xba   : > { %633 = vmatmul.mubr.bf16.gmra.mrb[16].mxu0 %v528_v19 }
  0xbb   : > { %640 = vmatprep.mubr.bf16.mxu0 %v531_v20 }
  0xc2   : > { %641 = vmatmul.mubr.bf16.gmra.mrb[20].mxu0 %v530_v22 }
  0xc3   : > { %648 = vmatprep.mubr.bf16.mxu0 %v533_v23 }
  0xca   : > { %649 = vmatmul.mubr.bf16.gmra.mrb[24].mxu0 %v532_v25  ;;  %v1789_v25 = vld [vmem:[%s1884_s10 + $0x28] sm:$0xff]  }
  0xcb   : > { %656 = vmatprep.mubr.bf16.mxu0 %v535_v26 }
  0xd2   : > { %657 = vmatmul.mubr.bf16.gmra.mrb[28].mxu0 %v534_v28 }
  0xd3   : > { %664 = vmatprep.mubr.bf16.mxu0 %v537_v29 }
  0xda   : > { %665 = vmatmul.mubr.bf16.gmra.mrb[32].mxu0 %v536_v31 }
  0xdb   : > { %672 = vmatprep.mubr.bf16.mxu0 %v539_v32 }
  0xe2   : > { %673 = vmatmul.mubr.bf16.gmra.mrb[36].mxu0 %v538_v34 }
  0xe3   : > { %680 = vmatprep.mubr.bf16.mxu0 %v541_v35 }
  0xea   : > { %681 = vmatmul.mubr.bf16.gmra.mrb[40].mxu0 %v540_v37 }
  0xeb   : > { %688 = vmatprep.mubr.bf16.mxu0 %v543_v38 }
  0xf2   : > { %689 = vmatmul.mubr.bf16.gmra.mrb[44].mxu0 %v542_v41 }
  0xf3   : > { %696 = vmatprep.mubr.bf16.mxu0 %v545_v42 }
  0xfa   : > { %697 = vmatmul.mubr.bf16.gmra.mrb[48].mxu0 %v544_v46 }
  0xfb   : > { %704 = vmatprep.mubr.bf16.mxu0 %v547_v47 }
 0x102   : > { %705 = vmatmul.mubr.bf16.gmra.mrb[52].mxu0 %v546_v50 }
 0x103   : > { %712 = vmatprep.mubr.bf16.mxu0 %v549_v51 }
 0x10a   : > { %713 = vmatmul.mubr.bf16.gmra.mrb[56].mxu0 %v548_v53 }
 0x10b   : > { %720 = vmatprep.mubr.bf16.mxu0 %v551_v54 }
 0x112   : > { %721 = vmatmul.mubr.bf16.gmra.mrb[60].mxu0 %v550_v55 }
 0x16d   : > { %v1496_v56 = vpop.f32.mrb[0].mxu0 }
 0x16e   : > { %v1497_v58 = vpop.f32.mrb[1].mxu0 }
 0x16f   : > { %v1498_v59 = vadd.f32 %v1497_v58, %v1496_v56  ;;  %v1499_v60 = vpop.f32.mrb[2].mxu0 }
 0x170   : > { %v1500_v61 = vpop.f32.mrb[3].mxu0 }
 0x171   : > { %v1501_v62 = vadd.f32 %v1500_v61, %v1499_v60 }
 0x173   : > { %v729_v63 = vpack.c.bf16 %v1501_v62, %v1498_v59 }
 0x175   : > { %v1502_v0 = vpop.f32.mrb[4].mxu0  ;;  %1656 = vmatprep.mubr.bf16.mxu1 %v729_v63 }
 0x176   : > { %v1503_v1 = vpop.f32.mrb[5].mxu0 }
 0x177   : > { %v1504_v2 = vadd.f32 %v1503_v1, %v1502_v0  ;;  %v1505_v3 = vpop.f32.mrb[6].mxu0 }
 0x178   : > { %v1506_v4 = vpop.f32.mrb[7].mxu0 }
 0x179   : > { %v1507_v5 = vadd.f32 %v1506_v4, %v1505_v3 }
 0x17b   : > { %v730_v6 = vpack.c.bf16 %v1507_v5, %v1504_v2 }
 0x17d   : > { %v1508_v8 = vpop.f32.mrb[8].mxu0  ;;  %1657 = vmatmul.mubr.bf16.vlgmr.msra.gmra.mrb[0].mxu1 %v730_v6 }
 0x17e   : > { %v1509_v9 = vpop.f32.mrb[9].mxu0  ;;  %1689 = vmatpush3.bf16.msra.mxu1 %v1784_v57 }
 0x17f   : > { %v1510_v10 = vadd.f32 %v1509_v9, %v1508_v8  ;;  %v1511_v11 = vpop.f32.mrb[10].mxu0  ;;  %1690 = vmatprep.subr.bf16.mxu1 %v1785_v7 }
 0x180   : > { %v1512_v13 = vpop.f32.mrb[11].mxu0 }
 0x181   : > { %v1513_v14 = vadd.f32 %v1512_v13, %v1511_v11 }
 0x182   : > { %1691 = vmatpush3.bf16.msra.mxu1 %v1785_v7 }
 0x183   : > { %v731_v15 = vpack.c.bf16 %v1513_v14, %v1510_v10  ;;  %1692 = vmatprep.subr.bf16.mxu1 %v1786_v12 }
 0x185   : > { %v1514_v17 = vpop.f32.mrb[12].mxu0  ;;  %1660 = vmatprep.mubr.bf16.mxu1 %v731_v15 }
 0x186   : > { %v1515_v18 = vpop.f32.mrb[13].mxu0  ;;  %1693 = vmatpush3.bf16.msra.mxu1 %v1786_v12 }
 0x187   : > { %v1516_v19 = vadd.f32 %v1515_v18, %v1514_v17  ;;  %v1517_v20 = vpop.f32.mrb[14].mxu0  ;;  %1694 = vmatprep.subr.bf16.mxu1 %v1787_v16 }
 0x188   : > { %v1518_v22 = vpop.f32.mrb[15].mxu0 }
 0x189   : > { %v1519_v23 = vadd.f32 %v1518_v22, %v1517_v20  ;;  %v1790_v22 = vld [vmem:[%s1884_s10 + $0x30] sm:$0xff]  }
 0x18a   : > { %1695 = vmatpush3.bf16.msra.mxu1 %v1787_v16 }
 0x18b   : > { %v732_v24 = vpack.c.bf16 %v1519_v23, %v1516_v19  ;;  %1696 = vmatprep.subr.bf16.mxu1 %v1788_v21 }
 0x18d   : > { %v1520_v26 = vpop.f32.mrb[16].mxu0  ;;  %1661 = vmatmul.mubr.bf16.gmra.mrb[4].mxu1 %v732_v24 }
 0x18e   : > { %v1521_v27 = vpop.f32.mrb[17].mxu0  ;;  %1697 = vmatpush3.bf16.msra.mxu1 %v1788_v21 }
 0x18f   : > { %v1522_v28 = vadd.f32 %v1521_v27, %v1520_v26  ;;  %v1523_v29 = vpop.f32.mrb[18].mxu0  ;;  %1698 = vmatprep.subr.bf16.mxu1 %v1789_v25  ;;  %v1791_v26 = vld [vmem:[%s1884_s10 + $0x38] sm:$0xff]  }
 0x190   : > { %v1524_v30 = vpop.f32.mrb[19].mxu0 }
 0x191   : > { %v1525_v31 = vadd.f32 %v1524_v30, %v1523_v29 }
 0x192   : > { %1699 = vmatpush3.bf16.msra.mxu1 %v1789_v25 }
 0x193   : > { %v733_v32 = vpack.c.bf16 %v1525_v31, %v1522_v28  ;;  %1700 = vmatprep.subr.bf16.mxu1 %v1790_v22 }
 0x195   : > { %v1526_v33 = vpop.f32.mrb[20].mxu0  ;;  %1664 = vmatprep.mubr.bf16.mxu1 %v733_v32 }
 0x196   : > { %v1527_v34 = vpop.f32.mrb[21].mxu0  ;;  %1701 = vmatpush3.bf16.msra.mxu1 %v1790_v22 }
 0x197   : > { %v1528_v35 = vadd.f32 %v1527_v34, %v1526_v33  ;;  %v1529_v36 = vpop.f32.mrb[22].mxu0  ;;  %1702 = vmatprep.subr.bf16.mxu1 %v1791_v26 }
 0x198   : > { %v1530_v37 = vpop.f32.mrb[23].mxu0 }
 0x199   : > { %v1531_v38 = vadd.f32 %v1530_v37, %v1529_v36 }
 0x19a   : > { %1703 = vmatpush3.bf16.msra.mxu1 %v1791_v26 }
 0x19b   : > { %v734_v39 = vpack.c.bf16 %v1531_v38, %v1528_v35 }
 0x19d   : > { %v1532_v40 = vpop.f32.mrb[24].mxu0  ;;  %1665 = vmatmul.mubr.bf16.gmra.mrb[8].mxu1 %v734_v39 }
 0x19e   : > { %v1533_v41 = vpop.f32.mrb[25].mxu0 }
 0x19f   : > { %v1534_v42 = vadd.f32 %v1533_v41, %v1532_v40  ;;  %v1535_v43 = vpop.f32.mrb[26].mxu0 }
 0x1a0   : > { %v1536_v44 = vpop.f32.mrb[27].mxu0 }
 0x1a1   : > { %v1537_v45 = vadd.f32 %v1536_v44, %v1535_v43 }
 0x1a3   : > { %v735_v46 = vpack.c.bf16 %v1537_v45, %v1534_v42 }
 0x1a5   : > { %v1538_v47 = vpop.f32.mrb[28].mxu0  ;;  %1668 = vmatprep.mubr.bf16.mxu1 %v735_v46 }
 0x1a6   : > { %v1539_v48 = vpop.f32.mrb[29].mxu0 }
 0x1a7   : > { %v1540_v49 = vadd.f32 %v1539_v48, %v1538_v47  ;;  %v1541_v50 = vpop.f32.mrb[30].mxu0 }
 0x1a8   : > { %v1542_v51 = vpop.f32.mrb[31].mxu0 }
 0x1a9   : > { %v1543_v52 = vadd.f32 %v1542_v51, %v1541_v50 }
 0x1ab   : > { %v736_v53 = vpack.c.bf16 %v1543_v52, %v1540_v49  ;;  %v2195_v49 = vld [vmem:[%s277_s28] ss:$0 sm:$0xff] }
 0x1ad   : > { %v1544_v54 = vpop.f32.mrb[32].mxu0  ;;  %1669 = vmatmul.mubr.bf16.gmra.mrb[12].mxu1 %v736_v53 }
 0x1ae   : > { %v1545_v55 = vpop.f32.mrb[33].mxu0 }
 0x1af   : > { %v1546_v56 = vadd.f32 %v1545_v55, %v1544_v54  ;;  %v1547_v57 = vpop.f32.mrb[34].mxu0 }
 0x1b0   : > { %v1548_v58 = vpop.f32.mrb[35].mxu0 }
 0x1b1   : > { %v1549_v59 = vadd.f32 %v1548_v58, %v1547_v57 }
 0x1b3   : > { %v737_v60 = vpack.c.bf16 %v1549_v59, %v1546_v56 }
 0x1b5   : > { %v1550_v61 = vpop.f32.mrb[36].mxu0  ;;  %1672 = vmatprep.mubr.bf16.mxu1 %v737_v60 }
 0x1b6   : > { %v1551_v62 = vpop.f32.mrb[37].mxu0 }
 0x1b7   : > { %v1552_v63 = vadd.f32 %v1551_v62, %v1550_v61  ;;  %v1553_v0 = vpop.f32.mrb[38].mxu0 }
 0x1b8   : > { %v1554_v1 = vpop.f32.mrb[39].mxu0 }
 0x1b9   : > { %v1555_v2 = vadd.f32 %v1554_v1, %v1553_v0 }
 0x1bb   : > { %v738_v3 = vpack.c.bf16 %v1555_v2, %v1552_v63 }
 0x1bd   : > { %v1556_v4 = vpop.f32.mrb[40].mxu0  ;;  %1673 = vmatmul.mubr.bf16.gmra.mrb[16].mxu1 %v738_v3 }
 0x1be   : > { %v1557_v5 = vpop.f32.mrb[41].mxu0 }
 0x1bf   : > { %v1558_v6 = vadd.f32 %v1557_v5, %v1556_v4  ;;  %v1559_v7 = vpop.f32.mrb[42].mxu0 }
 0x1c0   : > { %v1560_v8 = vpop.f32.mrb[43].mxu0 }
 0x1c1   : > { %v1561_v9 = vadd.f32 %v1560_v8, %v1559_v7 }
 0x1c3   : > { %v739_v10 = vpack.c.bf16 %v1561_v9, %v1558_v6 }
 0x1c5   : > { %v1562_v11 = vpop.f32.mrb[44].mxu0  ;;  %1676 = vmatprep.mubr.bf16.mxu1 %v739_v10 }
 0x1c6   : > { %v1563_v12 = vpop.f32.mrb[45].mxu0 }
 0x1c7   : > { %v1564_v13 = vadd.f32 %v1563_v12, %v1562_v11  ;;  %v1565_v14 = vpop.f32.mrb[46].mxu0 }
 0x1c8   : > { %v1566_v15 = vpop.f32.mrb[47].mxu0 }
 0x1c9   : > { %v1567_v16 = vadd.f32 %v1566_v15, %v1565_v14 }
 0x1cb   : > { %v740_v17 = vpack.c.bf16 %v1567_v16, %v1564_v13 }
 0x1cd   : > { %v1568_v18 = vpop.f32.mrb[48].mxu0  ;;  %1677 = vmatmul.mubr.bf16.gmra.mrb[20].mxu1 %v740_v17 }
 0x1ce   : > { %v1569_v19 = vpop.f32.mrb[49].mxu0 }
 0x1cf   : > { %v1570_v20 = vadd.f32 %v1569_v19, %v1568_v18  ;;  %v1571_v21 = vpop.f32.mrb[50].mxu0 }
 0x1d0   : > { %v1572_v23 = vpop.f32.mrb[51].mxu0 }
 0x1d1   : > { %v1573_v24 = vadd.f32 %v1572_v23, %v1571_v21 }
 0x1d3   : > { %v741_v25 = vpack.c.bf16 %v1573_v24, %v1570_v20 }
 0x1d5   : > { %v1574_v27 = vpop.f32.mrb[52].mxu0  ;;  %1680 = vmatprep.mubr.bf16.mxu1 %v741_v25 }
 0x1d6   : > { %v1575_v28 = vpop.f32.mrb[53].mxu0 }
 0x1d7   : > { %v1576_v29 = vadd.f32 %v1575_v28, %v1574_v27  ;;  %v1577_v30 = vpop.f32.mrb[54].mxu0 }
 0x1d8   : > { %v1578_v31 = vpop.f32.mrb[55].mxu0 }
 0x1d9   : > { %v1579_v32 = vadd.f32 %v1578_v31, %v1577_v30 }
 0x1db   : > { %v742_v33 = vpack.c.bf16 %v1579_v32, %v1576_v29 }
 0x1dd   : > { %v1580_v34 = vpop.f32.mrb[56].mxu0  ;;  %1681 = vmatmul.mubr.bf16.gmra.mrb[24].mxu1 %v742_v33 }
 0x1de   : > { %v1581_v35 = vpop.f32.mrb[57].mxu0 }
 0x1df   : > { %v1582_v36 = vadd.f32 %v1581_v35, %v1580_v34  ;;  %v1583_v37 = vpop.f32.mrb[58].mxu0 }
 0x1e0   : > { %v1584_v38 = vpop.f32.mrb[59].mxu0 }
 0x1e1   : > { %v1585_v39 = vadd.f32 %v1584_v38, %v1583_v37 }
 0x1e3   : > { %v743_v40 = vpack.c.bf16 %v1585_v39, %v1582_v36 }
 0x1e5   : > { %v1586_v41 = vpop.f32.mrb[60].mxu0  ;;  %1684 = vmatprep.mubr.bf16.mxu1 %v743_v40 }
 0x1e6   : > { %v1587_v42 = vpop.f32.mrb[61].mxu0 }
 0x1e7   : > { %v1588_v43 = vadd.f32 %v1587_v42, %v1586_v41  ;;  %v1589_v44 = vpop.f32.mrb[62].mxu0 }
 0x1e8   : > { %v1590_v45 = vpop.f32.mrb[63].mxu0 }
 0x1e9   : > { %v1591_v46 = vadd.f32 %v1590_v45, %v1589_v44 }
 0x1eb   : > { %v744_v47 = vpack.c.bf16 %v1591_v46, %v1588_v43 }
 0x1ed   : > { %1685 = vmatmul.mubr.bf16.gmra.mrb[28].mxu1 %v744_v47 }
 0x250   : > { %v1658_v48 = vpop.f32.mrb[0].mxu1 }
 0x251   : > { %v850_v50 = vpop.f32.mrb[1].mxu1  ;;  %v859_v52 = vadd.f32 %v1658_v48, %v2195_v49 }
 0x252   : > { %v1659_v51 = vpop.f32.mrb[2].mxu1  ;;  %v851_v55 = vadd.f32 %v2195_v49, %v850_v50 }
 0x253   : > { %v862_v53 = vadd.f32 %v1659_v51, %v2195_v49  ;;  %v853_v54 = vpop.f32.mrb[3].mxu1 }
 0x254   : > { %v854_v56 = vadd.f32 %v2195_v49, %v853_v54 }
 0x255   : > { %v978_v57 = vpack.c.bf16 %v862_v53, %v859_v52 }
 0x256   : > { %v977_v58 = vpack.c.bf16 %v854_v56, %v851_v55 }
 0x257   : > { %1355 = vst [vmem:[#allocation2 + $0x8] sm:$0xff] %v978_v57 }
 0x258   : > { %1354 = vst [vmem:[#allocation2] sm:$0xff] %v977_v58  ;;  %1704 = vmatprep.mubr.bf16.mxu1 %v977_v58 }
 0x259   : > { %1705 = vmatmul.mubr.bf16.vlgmr.msra.gmra.mrb[32].mxu1 %v978_v57 }
 0x260   : > { %v1662_v59 = vpop.f32.mrb[4].mxu1 }
 0x261   : > { %v866_v60 = vpop.f32.mrb[5].mxu1  ;;  %v875_v62 = vadd.f32 %v1662_v59, %v2195_v49 }
 0x262   : > { %v1663_v61 = vpop.f32.mrb[6].mxu1  ;;  %v867_v1 = vadd.f32 %v2195_v49, %v866_v60 }
 0x263   : > { %v878_v63 = vadd.f32 %v1663_v61, %v2195_v49  ;;  %v869_v0 = vpop.f32.mrb[7].mxu1 }
 0x264   : > { %v870_v2 = vadd.f32 %v2195_v49, %v869_v0 }
 0x265   : > { %v980_v3 = vpack.c.bf16 %v878_v63, %v875_v62 }
 0x266   : > { %v979_v4 = vpack.c.bf16 %v870_v2, %v867_v1  ;;  %v1016_v2 = vld [vmem:[%s2436_s6 + $0x10] sm:$0xff] }
 0x267   : > { %1357 = vst [vmem:[#allocation2 + $0x18] sm:$0xff] %v980_v3 }
 0x268   : > { %1356 = vst [vmem:[#allocation2 + $0x10] sm:$0xff] %v979_v4  ;;  %1708 = vmatprep.mubr.bf16.mxu1 %v979_v4 }
 0x269   : > { %1709 = vmatmul.mubr.bf16.gmra.mrb[36].mxu1 %v980_v3  ;;  %v1014_v3 = vld [vmem:[%s2436_s6] sm:$0xff] }
 0x270   : > { %v1666_v5 = vpop.f32.mrb[8].mxu1 }
 0x271   : > { %v882_v6 = vpop.f32.mrb[9].mxu1  ;;  %v891_v8 = vadd.f32 %v1666_v5, %v2195_v49  ;;  %v1017_v5 = vld [vmem:[%s2436_s6 + $0x18] sm:$0xff] }
 0x272   : > { %v1667_v7 = vpop.f32.mrb[10].mxu1  ;;  %v883_v11 = vadd.f32 %v2195_v49, %v882_v6 }
 0x273   : > { %v894_v9 = vadd.f32 %v1667_v7, %v2195_v49  ;;  %v885_v10 = vpop.f32.mrb[11].mxu1  ;;  %v1015_v7 = vld [vmem:[%s2436_s6 + $0x8] sm:$0xff] }
 0x274   : > { %v886_v12 = vadd.f32 %v2195_v49, %v885_v10 }
 0x275   : > { %v982_v13 = vpack.c.bf16 %v894_v9, %v891_v8 }
 0x276   : > { %v981_v14 = vpack.c.bf16 %v886_v12, %v883_v11 }
 0x277   : > { %1359 = vst [vmem:[#allocation2 + $0x28] sm:$0xff] %v982_v13 }
 0x278   : > { %1358 = vst [vmem:[#allocation2 + $0x20] sm:$0xff] %v981_v14  ;;  %1712 = vmatprep.mubr.bf16.mxu1 %v981_v14  ;;  %v1018_v14 = vld [vmem:[%s2436_s6 + $0x20] sm:$0xff] }
 0x279   : > { %1713 = vmatmul.mubr.bf16.gmra.mrb[40].mxu1 %v982_v13  ;;  %v1020_v13 = vld [vmem:[%s2436_s6 + $0x30] sm:$0xff] }
 0x280   : > { %v1670_v15 = vpop.f32.mrb[12].mxu1 }
 0x281   : > { %v898_v16 = vpop.f32.mrb[13].mxu1  ;;  %v907_v18 = vadd.f32 %v1670_v15, %v2195_v49 }
 0x282   : > { %v1671_v17 = vpop.f32.mrb[14].mxu1  ;;  %v899_v21 = vadd.f32 %v2195_v49, %v898_v16  ;;  %v1021_v16 = vld [vmem:[%s2436_s6 + $0x38] sm:$0xff] }
 0x283   : > { %v910_v19 = vadd.f32 %v1671_v17, %v2195_v49  ;;  %v901_v20 = vpop.f32.mrb[15].mxu1 }
 0x284   : > { %v902_v22 = vadd.f32 %v2195_v49, %v901_v20 }
 0x285   : > { %v984_v23 = vpack.c.bf16 %v910_v19, %v907_v18  ;;  %v1019_v19 = vld [vmem:[%s2436_s6 + $0x28] sm:$0xff] }
 0x286   : > { %v983_v24 = vpack.c.bf16 %v902_v22, %v899_v21 }
 0x287   : > { %1361 = vst [vmem:[#allocation2 + $0x38] sm:$0xff] %v984_v23 }
 0x288   : > { %1360 = vst [vmem:[#allocation2 + $0x30] sm:$0xff] %v983_v24  ;;  %1716 = vmatprep.mubr.bf16.mxu1 %v983_v24 }
 0x289   : > { %1717 = vmatmul.mubr.bf16.gmra.mrb[44].mxu1 %v984_v23 }
 0x290   : > { %v1674_v25 = vpop.f32.mrb[16].mxu1 }
 0x291   : > { %v914_v26 = vpop.f32.mrb[17].mxu1  ;;  %v923_v28 = vadd.f32 %v1674_v25, %v2195_v49  ;;  %v1024_v25 = vld [vmem:[%s2436_s6 + $0x50] sm:$0xff] }
 0x292   : > { %v1675_v27 = vpop.f32.mrb[18].mxu1  ;;  %v915_v31 = vadd.f32 %v2195_v49, %v914_v26  ;;  %v1022_v26 = vld [vmem:[%s2436_s6 + $0x40] sm:$0xff] }
 0x293   : > { %v926_v29 = vadd.f32 %v1675_v27, %v2195_v49  ;;  %v917_v30 = vpop.f32.mrb[19].mxu1 }
 0x294   : > { %v918_v32 = vadd.f32 %v2195_v49, %v917_v30 }
 0x295   : > { %v986_v33 = vpack.c.bf16 %v926_v29, %v923_v28  ;;  %v1025_v28 = vld [vmem:[%s2436_s6 + $0x58] sm:$0xff] }
 0x296   : > { %v985_v34 = vpack.c.bf16 %v918_v32, %v915_v31  ;;  %v1023_v31 = vld [vmem:[%s2436_s6 + $0x48] sm:$0xff] }
 0x297   : > { %1363 = vst [vmem:[#allocation2 + $0x48] sm:$0xff] %v986_v33 }
 0x298   : > { %1362 = vst [vmem:[#allocation2 + $0x40] sm:$0xff] %v985_v34  ;;  %1720 = vmatprep.mubr.bf16.mxu1 %v985_v34 }
 0x299   : > { %1721 = vmatmul.mubr.bf16.gmra.mrb[48].mxu1 %v986_v33 }
 0x2a0   : > { %v1678_v35 = vpop.f32.mrb[20].mxu1 }
 0x2a1   : > { %v930_v36 = vpop.f32.mrb[21].mxu1  ;;  %v939_v38 = vadd.f32 %v1678_v35, %v2195_v49 }
 0x2a2   : > { %v1679_v37 = vpop.f32.mrb[22].mxu1  ;;  %v931_v41 = vadd.f32 %v2195_v49, %v930_v36 }
 0x2a3   : > { %v942_v39 = vadd.f32 %v1679_v37, %v2195_v49  ;;  %v933_v40 = vpop.f32.mrb[23].mxu1  ;;  %v1028_v37 = vld [vmem:[%s2436_s6 + $0x70] sm:$0xff] }
 0x2a4   : > { %v934_v42 = vadd.f32 %v2195_v49, %v933_v40  ;;  %v1029_v40 = vld [vmem:[%s2436_s6 + $0x78] sm:$0xff] }
 0x2a5   : > { %v988_v43 = vpack.c.bf16 %v942_v39, %v939_v38  ;;  %v1026_v38 = vld [vmem:[%s2436_s6 + $0x60] sm:$0xff] }
 0x2a6   : > { %v987_v44 = vpack.c.bf16 %v934_v42, %v931_v41 }
 0x2a7   : > { %1365 = vst [vmem:[#allocation2 + $0x58] sm:$0xff] %v988_v43 }
 0x2a8   : > { %1364 = vst [vmem:[#allocation2 + $0x50] sm:$0xff] %v987_v44  ;;  %1724 = vmatprep.mubr.bf16.mxu1 %v987_v44 }
 0x2a9   : > { %1725 = vmatmul.mubr.bf16.gmra.mrb[52].mxu1 %v988_v43  ;;  %v1027_v43 = vld [vmem:[%s2436_s6 + $0x68] sm:$0xff] }
 0x2b0   : > { %v1682_v45 = vpop.f32.mrb[24].mxu1 }
 0x2b1   : > { %v946_v46 = vpop.f32.mrb[25].mxu1  ;;  %v955_v48 = vadd.f32 %v1682_v45, %v2195_v49 }
 0x2b2   : > { %v1683_v47 = vpop.f32.mrb[26].mxu1  ;;  %v947_v52 = vadd.f32 %v2195_v49, %v946_v46 }
 0x2b3   : > { %v958_v50 = vadd.f32 %v1683_v47, %v2195_v49  ;;  %v949_v51 = vpop.f32.mrb[27].mxu1 }
 0x2b4   : > { %v950_v53 = vadd.f32 %v2195_v49, %v949_v51  ;;  %v1030_v51 = vld [vmem:[%s2436_s6 + $0x80] sm:$0xff] }
 0x2b5   : > { %v990_v54 = vpack.c.bf16 %v958_v50, %v955_v48  ;;  %v1032_v50 = vld [vmem:[%s2436_s6 + $0x90] sm:$0xff] }
 0x2b6   : > { %v989_v55 = vpack.c.bf16 %v950_v53, %v947_v52  ;;  %v1033_v53 = vld [vmem:[%s2436_s6 + $0x98] sm:$0xff] }
 0x2b7   : > { %1367 = vst [vmem:[#allocation2 + $0x68] sm:$0xff] %v990_v54 }
 0x2b8   : > { %1366 = vst [vmem:[#allocation2 + $0x60] sm:$0xff] %v989_v55  ;;  %1728 = vmatprep.mubr.bf16.mxu1 %v989_v55 }
 0x2b9   : > { %1729 = vmatmul.mubr.bf16.gmra.mrb[56].mxu1 %v990_v54 }
 0x2c0   : > { %v1686_v56 = vpop.f32.mrb[28].mxu1 }
 0x2c1   : > { %v962_v57 = vpop.f32.mrb[29].mxu1  ;;  %v971_v59 = vadd.f32 %v1686_v56, %v2195_v49  ;;  %v1031_v56 = vld [vmem:[%s2436_s6 + $0x88] sm:$0xff] }
 0x2c2   : > { %v1687_v58 = vpop.f32.mrb[30].mxu1  ;;  %v963_v62 = vadd.f32 %v2195_v49, %v962_v57 }
 0x2c3   : > { %v974_v60 = vadd.f32 %v1687_v58, %v2195_v49  ;;  %v965_v61 = vpop.f32.mrb[31].mxu1 }
 0x2c4   : > { %v966_v63 = vadd.f32 %v2195_v49, %v965_v61 }
 0x2c5   : > { %v992_v0 = vpack.c.bf16 %v974_v60, %v971_v59 }
 0x2c6   : > { %v991_v1 = vpack.c.bf16 %v966_v63, %v963_v62  ;;  %v1036_v62 = vld [vmem:[%s2436_s6 + $0xb0] sm:$0xff]  ;;  %v1034_v63 = vld [vmem:[%s2436_s6 + $0xa0] sm:$0xff] }
 0x2c7   : > { %1369 = vst [vmem:[#allocation2 + $0x78] sm:$0xff] %v992_v0 }
 0x2c8   : > { %1368 = vst [vmem:[#allocation2 + $0x70] sm:$0xff] %v991_v1  ;;  %1732 = vmatprep.mubr.bf16.mxu1 %v991_v1  ;;  %v1037_v1 = vld [vmem:[%s2436_s6 + $0xb8] sm:$0xff] }
 0x2c9   : > { %1733 = vmatmul.mubr.bf16.gmra.mrb[60].mxu1 %v992_v0 }
 0x32c   : > { %v1706_v4 = vpop.f32.mrb[32].mxu1 }
 0x32d   : > { %v1273_v49 = vadd.f32 %v1706_v4, %v1016_v2  ;;  %v1144_v6 = vpop.f32.mrb[33].mxu1  ;;  %v1035_v4 = vld [vmem:[%s2436_s6 + $0xa8] sm:$0xff] }
 0x32e   : > { %v1271_v8 = vadd.f32 %v1144_v6, %v1014_v3  ;;  %v1707_v9 = vpop.f32.mrb[34].mxu1 }
 0x32f   : > { %1305 = vst [vmem:[%s2436_s6 + $0x10] sm:$0xff] %v1273_v49  ;;  %v1274_v10 = vadd.f32 %v1707_v9, %v1017_v5  ;;  %v1147_v11 = vpop.f32.mrb[35].mxu1  ;;  %v1040_v9 = vld [vmem:[%s2436_s6 + $0xd0] sm:$0xff] }
 0x330   : > { %1303 = vst [vmem:[%s2436_s6] sm:$0xff] %v1271_v8  ;;  %v1272_v12 = vadd.f32 %v1147_v11, %v1015_v7 }
 0x331   : > { %1306 = vst [vmem:[%s2436_s6 + $0x18] sm:$0xff] %v1274_v10  ;;  %v1038_v10 = vld [vmem:[%s2436_s6 + $0xc0] sm:$0xff] }
 0x332   : > { %1304 = vst [vmem:[%s2436_s6 + $0x8] sm:$0xff] %v1272_v12  ;;  %v1041_v12 = vld [vmem:[%s2436_s6 + $0xd8] sm:$0xff] }
 0x33c   : > { %v1710_v15 = vpop.f32.mrb[36].mxu1 }
 0x33d   : > { %v1277_v17 = vadd.f32 %v1710_v15, %v1020_v13  ;;  %v1160_v18 = vpop.f32.mrb[37].mxu1  ;;  %v1039_v15 = vld [vmem:[%s2436_s6 + $0xc8] sm:$0xff] }
 0x33e   : > { %v1275_v20 = vadd.f32 %v1160_v18, %v1018_v14  ;;  %v1711_v21 = vpop.f32.mrb[38].mxu1 }
 0x33f   : > { %1309 = vst [vmem:[%s2436_s6 + $0x30] sm:$0xff] %v1277_v17  ;;  %v1278_v22 = vadd.f32 %v1711_v21, %v1021_v16  ;;  %v1163_v23 = vpop.f32.mrb[39].mxu1  ;;  %v1044_v21 = vld [vmem:[%s2436_s6 + $0xf0] sm:$0xff] }
 0x340   : > { %1307 = vst [vmem:[%s2436_s6 + $0x20] sm:$0xff] %v1275_v20  ;;  %v1276_v24 = vadd.f32 %v1163_v23, %v1019_v19 }
 0x341   : > { %1310 = vst [vmem:[%s2436_s6 + $0x38] sm:$0xff] %v1278_v22  ;;  %v1042_v22 = vld [vmem:[%s2436_s6 + $0xe0] sm:$0xff] }
 0x342   : > { %1308 = vst [vmem:[%s2436_s6 + $0x28] sm:$0xff] %v1276_v24  ;;  %v1045_v24 = vld [vmem:[%s2436_s6 + $0xf8] sm:$0xff] }
 0x34c   : > { %v1714_v27 = vpop.f32.mrb[40].mxu1 }
 0x34d   : > { %v1281_v29 = vadd.f32 %v1714_v27, %v1024_v25  ;;  %v1176_v30 = vpop.f32.mrb[41].mxu1  ;;  %v1043_v27 = vld [vmem:[%s2436_s6 + $0xe8] sm:$0xff] }
 0x34e   : > { %v1279_v32 = vadd.f32 %v1176_v30, %v1022_v26  ;;  %v1715_v33 = vpop.f32.mrb[42].mxu1 }
 0x34f   : > { %1313 = vst [vmem:[%s2436_s6 + $0x50] sm:$0xff] %v1281_v29  ;;  %v1282_v34 = vadd.f32 %v1715_v33, %v1025_v28  ;;  %v1179_v35 = vpop.f32.mrb[43].mxu1 }
 0x350   : > { %1311 = vst [vmem:[%s2436_s6 + $0x40] sm:$0xff] %v1279_v32  ;;  %v1280_v36 = vadd.f32 %v1179_v35, %v1023_v31 }
 0x351   : > { %1314 = vst [vmem:[%s2436_s6 + $0x58] sm:$0xff] %v1282_v34 }
 0x352   : > { %1312 = vst [vmem:[%s2436_s6 + $0x48] sm:$0xff] %v1280_v36 }
 0x35c   : > { %v1718_v39 = vpop.f32.mrb[44].mxu1 }
 0x35d   : > { %v1285_v41 = vadd.f32 %v1718_v39, %v1028_v37  ;;  %v1192_v42 = vpop.f32.mrb[45].mxu1 }
 0x35e   : > { %v1283_v44 = vadd.f32 %v1192_v42, %v1026_v38  ;;  %v1719_v45 = vpop.f32.mrb[46].mxu1 }
 0x35f   : > { %1317 = vst [vmem:[%s2436_s6 + $0x70] sm:$0xff] %v1285_v41  ;;  %v1286_v46 = vadd.f32 %v1719_v45, %v1029_v40  ;;  %v1195_v47 = vpop.f32.mrb[47].mxu1 }
 0x360   : > { %1315 = vst [vmem:[%s2436_s6 + $0x60] sm:$0xff] %v1283_v44  ;;  %v1284_v48 = vadd.f32 %v1195_v47, %v1027_v43 }
 0x361   : > { %1318 = vst [vmem:[%s2436_s6 + $0x78] sm:$0xff] %v1286_v46 }
 0x362   : > { %1316 = vst [vmem:[%s2436_s6 + $0x68] sm:$0xff] %v1284_v48 }
 0x36c   : > { %v1722_v52 = vpop.f32.mrb[48].mxu1 }
 0x36d   : > { %v1289_v54 = vadd.f32 %v1722_v52, %v1032_v50  ;;  %v1208_v55 = vpop.f32.mrb[49].mxu1 }
 0x36e   : > { %v1287_v57 = vadd.f32 %v1208_v55, %v1030_v51  ;;  %v1723_v58 = vpop.f32.mrb[50].mxu1 }
 0x36f   : > { %1321 = vst [vmem:[%s2436_s6 + $0x90] sm:$0xff] %v1289_v54  ;;  %v1290_v59 = vadd.f32 %v1723_v58, %v1033_v53  ;;  %v1211_v60 = vpop.f32.mrb[51].mxu1 }
 0x370   : > { %1319 = vst [vmem:[%s2436_s6 + $0x80] sm:$0xff] %v1287_v57  ;;  %v1288_v61 = vadd.f32 %v1211_v60, %v1031_v56 }
 0x371   : > { %1322 = vst [vmem:[%s2436_s6 + $0x98] sm:$0xff] %v1290_v59 }
 0x372   : > { %1320 = vst [vmem:[%s2436_s6 + $0x88] sm:$0xff] %v1288_v61 }
 0x37c   : > { %v1726_v0 = vpop.f32.mrb[52].mxu1 }
 0x37d   : > { %v1293_v2 = vadd.f32 %v1726_v0, %v1036_v62  ;;  %v1224_v3 = vpop.f32.mrb[53].mxu1 }
 0x37e   : > { %v1291_v5 = vadd.f32 %v1224_v3, %v1034_v63  ;;  %v1727_v49 = vpop.f32.mrb[54].mxu1 }
 0x37f   : > { %1325 = vst [vmem:[%s2436_s6 + $0xb0] sm:$0xff] %v1293_v2  ;;  %v1294_v6 = vadd.f32 %v1727_v49, %v1037_v1  ;;  %v1227_v7 = vpop.f32.mrb[55].mxu1 }
 0x380   : > { %1323 = vst [vmem:[%s2436_s6 + $0xa0] sm:$0xff] %v1291_v5  ;;  %v1292_v8 = vadd.f32 %v1227_v7, %v1035_v4 }
 0x381   : > { %1326 = vst [vmem:[%s2436_s6 + $0xb8] sm:$0xff] %v1294_v6 }
 0x382   : > { %1324 = vst [vmem:[%s2436_s6 + $0xa8] sm:$0xff] %v1292_v8 }
 0x38c   : > { %v1730_v11 = vpop.f32.mrb[56].mxu1 }
 0x38d   : > { %v1297_v13 = vadd.f32 %v1730_v11, %v1040_v9  ;;  %v1240_v14 = vpop.f32.mrb[57].mxu1 }
 0x38e   : > { %v1295_v16 = vadd.f32 %v1240_v14, %v1038_v10  ;;  %v1731_v17 = vpop.f32.mrb[58].mxu1 }
 0x38f   : > { %1329 = vst [vmem:[%s2436_s6 + $0xd0] sm:$0xff] %v1297_v13  ;;  %v1298_v18 = vadd.f32 %v1731_v17, %v1041_v12  ;;  %v1243_v19 = vpop.f32.mrb[59].mxu1 }
 0x390   : > { %1327 = vst [vmem:[%s2436_s6 + $0xc0] sm:$0xff] %v1295_v16  ;;  %v1296_v20 = vadd.f32 %v1243_v19, %v1039_v15 }
 0x391   : > { %1330 = vst [vmem:[%s2436_s6 + $0xd8] sm:$0xff] %v1298_v18 }
 0x392   : > { %1328 = vst [vmem:[%s2436_s6 + $0xc8] sm:$0xff] %v1296_v20 }
 0x39c   : > { %v1734_v23 = vpop.f32.mrb[60].mxu1 }
 0x39d   : > { %v1301_v25 = vadd.f32 %v1734_v23, %v1044_v21  ;;  %v1256_v26 = vpop.f32.mrb[61].mxu1 }
 0x39e   : > { %v1299_v28 = vadd.f32 %v1256_v26, %v1042_v22  ;;  %v1735_v29 = vpop.f32.mrb[62].mxu1 }
 0x39f   : > { %1333 = vst [vmem:[%s2436_s6 + $0xf0] sm:$0xff] %v1301_v25  ;;  %v1302_v30 = vadd.f32 %v1735_v29, %v1045_v24  ;;  %v1259_v31 = vpop.f32.mrb[63].mxu1 }
 0x3a0   : > { %1331 = vst [vmem:[%s2436_s6 + $0xe0] sm:$0xff] %v1299_v28  ;;  %v1300_v32 = vadd.f32 %v1259_v31, %v1043_v27 }
 0x3a1   : > { %1334 = vst [vmem:[%s2436_s6 + $0xf8] sm:$0xff] %v1302_v30 }
 0x3a2   : > { %1332 = vst [vmem:[%s2436_s6 + $0xe8] sm:$0xff] %v1300_v32 }
 0x3a3 PF: > { %s16_s23 = sadd.s32 1, %s1814_s23   ;;  %s2437_s21 = smov %s1810_s22 }
 0x3a4   : > { %p13_p6 = scmp.ge.s32.totalorder %s16_s23, 4   ;;  %s2438_s22 = smov %s2440_s24 }
 0x3a6   :  { %15 = sbr.rel (!%p13_p6) target bundleno = 2 (0x2), region = 87 }

</bundles_post_ra>
